<compile_context>
chip_gen: v7x
topology: tpu7x:2x2x1
jax: 0.10.0
libtpu: 0.0.40
codegen_flags: <defaults>
</compile_context>

<pallas_src>
import functools

import jax
import jax.numpy as jnp
from jax import lax
from jax.experimental import pallas as pl
from jax.experimental.pallas import tpu as pltpu


# ----------------------------------------------------------------------------
# In-kernel helpers (f32 math)
# ----------------------------------------------------------------------------
def _layer_norm(x, w, b, eps=1e-5):
    mu = jnp.mean(x, axis=-1, keepdims=True)
    xc = x - mu
    var = jnp.mean(xc * xc, axis=-1, keepdims=True)
    return xc * lax.rsqrt(var + eps) * w + b


# ----------------------------------------------------------------------------
# Fused kernel: full TransformerEncoder (all layers) + final Linear(E -> 1)
# Grid: (batch_blocks,). Weights are VMEM-resident; layers looped in-kernel.
# ----------------------------------------------------------------------------
def fused_kernel(src_ref, bias_ref,
                 wqkv_ref, bqkv_ref, wo_ref, bo_ref, ln1w_ref, ln1b_ref,
                 w1_ref, b1_ref, w2_ref, b2_ref, ln2w_ref, ln2b_ref,
                 fcw_ref, fcb_ref,
                 out_ref,
                 *, num_heads, head_dim, bb, seq, emb, num_layers, ffn_tile):
    m = bb * seq
    x0 = src_ref[...].reshape(m, emb)          # f32 activations (resident value)
    bias = bias_ref[...]                       # (bb, 1, seq) additive key mask, f32

    def layer_body(l, x):
        # ---- per-layer weights: bf16 matmul weights, f32 biases / LN --------
        wqkv = wqkv_ref[l]                     # (E, 3E) bf16, Q cols pre-scaled
        bqkv = bqkv_ref[l]                     # (1, 3E) f32 (Q part pre-scaled)
        wo = wo_ref[l]                         # (E, E)  bf16
        bo = bo_ref[l]                         # (1, E)  f32
        w1 = w1_ref[l]                         # (E, 4E) bf16
        b1 = b1_ref[l]                         # (1, 4E) f32
        w2 = w2_ref[l]                         # (4E, E) bf16
        b2 = b2_ref[l]                         # (1, E)  f32

        # ---- QKV projection (bf16 MXU, f32 accumulate) -----------------------
        x_bf = x.astype(jnp.bfloat16)
        qkv = jnp.dot(x_bf, wqkv, preferred_element_type=jnp.float32) + bqkv

        # ---- self attention: batched over the bb sequences, heads unrolled;
        #      per-head context folded straight into the out-projection
        #      accumulator (no ctx scratch, no masked sub-lane stores). --------
        attn = jnp.zeros((m, emb), jnp.float32)
        for h in range(num_heads):
            lo = h * head_dim
            qh = qkv[:, lo:lo + head_dim].astype(jnp.bfloat16).reshape(bb, seq, head_dim)
            kh = qkv[:, emb + lo:emb + lo + head_dim].astype(jnp.bfloat16).reshape(bb, seq, head_dim)
            vh = qkv[:, 2 * emb + lo:2 * emb + lo + head_dim].astype(jnp.bfloat16).reshape(bb, seq, head_dim)
            s = jnp.einsum('bqd,bkd->bqk', qh, kh,
                           preferred_element_type=jnp.float32)        # (bb, S, S) f32
            s = s + bias                                              # f32 mask add
            s = s - jnp.max(s, axis=-1, keepdims=True)
            p = jnp.exp(s)
            p = p * pl.reciprocal(jnp.sum(p, axis=-1, keepdims=True), approx=True)
            oh = jnp.einsum('bqk,bkd->bqd', p.astype(jnp.bfloat16), vh,
                            preferred_element_type=jnp.float32)       # (bb, S, hd) f32
            attn = attn + jnp.dot(oh.reshape(m, head_dim).astype(jnp.bfloat16),
                                  wo[lo:lo + head_dim, :],
                                  preferred_element_type=jnp.float32)
        attn = attn + bo

        # residual + LayerNorm 1 (dropout == identity, eval)
        x = _layer_norm(x + attn, ln1w_ref[l], ln1b_ref[l])

        # ---- feed forward (ReLU), tiled over the 4E hidden dim ---------------
        x_bf = x.astype(jnp.bfloat16)
        ff = jnp.zeros((m, emb), jnp.float32)
        n_tiles = (4 * emb) // ffn_tile
        for t in range(n_tiles):
            flo = t * ffn_tile
            h1 = jnp.dot(x_bf, w1[:, flo:flo + ffn_tile],
                         preferred_element_type=jnp.float32)
            h1 = jnp.maximum(h1 + b1[:, flo:flo + ffn_tile], 0.0)
            ff = ff + jnp.dot(h1.astype(jnp.bfloat16), w2[flo:flo + ffn_tile, :],
                              preferred_element_type=jnp.float32)
        ff = ff + b2

        # residual + LayerNorm 2
        return _layer_norm(x + ff, ln2w_ref[l], ln2b_ref[l])

    x = lax.fori_loop(0, num_layers, layer_body, x0)

    # ---- final Linear(E -> 1), written lane-dense as one (1, 1, Bb*S) row ----
    y = jnp.sum(x * fcw_ref[...], axis=-1, keepdims=True) + fcb_ref[...]   # (M, 1)
    out_ref[...] = y.reshape(1, 1, m)


# ----------------------------------------------------------------------------
# Parameter init (deterministic, synthetic), already in kernel layout:
#   * matmul weights (in, out), stacked over layers, bf16
#   * 1/sqrt(head_dim) folded into the Q projection (weights and bias)
# ----------------------------------------------------------------------------
def init_params(key, num_categories, num_index, E, num_heads, num_layers):
    head_dim = E // num_heads
    scale = 1.0 / float(head_dim) ** 0.5

    def nrm(k, shape, s=0.05):
        return s * jax.random.normal(k, shape, jnp.float32)

    L = num_layers
    keys = jax.random.split(key, 11)
    wqkv = nrm(keys[3], (L, E, 3 * E))
    bqkv = nrm(keys[4], (L, 1, 3 * E))
    wqkv = wqkv.at[:, :, :E].multiply(scale)   # fold attention scale into Q
    bqkv = bqkv.at[:, :, :E].multiply(scale)

    return {
        "embedding": nrm(keys[0], (num_categories, E), 1.0),
        "step_emb": nrm(keys[1], (num_index, E), 1.0),
        "start_emb": jnp.zeros((num_index, E), jnp.float32),   # nn.init.zeros_
        "fc_w": nrm(keys[2], (1, E)),
        "fc_b": jnp.zeros((1, 1), jnp.float32),
        # bf16 matmul weights (halve HBM/VMEM traffic, feed MXU bf16 peak)
        "wqkv": wqkv.astype(jnp.bfloat16),
        "bqkv": bqkv,
        "wo": nrm(keys[5], (L, E, E)).astype(jnp.bfloat16),
        "bo": nrm(keys[6], (L, 1, E)),
        "ln1w": jnp.ones((L, 1, E), jnp.float32),
        "ln1b": jnp.zeros((L, 1, E), jnp.float32),
        "w1": nrm(keys[7], (L, E, 4 * E)).astype(jnp.bfloat16),
        "b1": nrm(keys[8], (L, 1, 4 * E)),
        "w2": nrm(keys[9], (L, 4 * E, E)).astype(jnp.bfloat16),
        "b2": nrm(keys[10], (L, 1, E)),
        "ln2w": jnp.ones((L, 1, E), jnp.float32),
        "ln2b": jnp.zeros((L, 1, E), jnp.float32),
    }


# ----------------------------------------------------------------------------
# Full forward (mirrors GraphTransformerVals.forward)
# ----------------------------------------------------------------------------
def graph_transformer_vals(params, src_val, src_cat, idx_step, idx_start,
                           num_heads, batch_block=None):
    B, S = src_val.shape
    E = params["embedding"].shape[1]
    L = params["wqkv"].shape[0]
    head_dim = E // num_heads

    # Never default Bb = B: keep >= 2 batch blocks so v7x's two TCs both work.
    if batch_block is None:
        Bb = B // 2 if (B % 2 == 0 and B >= 2) else B
    else:
        Bb = batch_block
    assert B % Bb == 0
    n_blocks = B // Bb

    src_val = src_val.astype(jnp.float32)
    mask = jnp.isnan(src_val)

    # Glue in plain JAX: embedding gathers + the trivial combine, and the
    # additive key-padding mask (f32, computed once, never recomputed per layer).
    val = jnp.where(mask, 0.0, src_val)
    src = val[:, :, None] * params["embedding"][src_cat]
    src = src + (params["step_emb"][idx_step]
                 + params["start_emb"][idx_start])[:, None, :]          # (B, S, E)
    bias = jnp.where(mask, -1e30, 0.0).astype(jnp.float32)[:, None, :]  # (B, 1, S)
    # TODO(synk): fully-NaN rows diverge from PyTorch's nested-tensor fast path
    # (which zeroes them); here they yield a uniform softmax over masked keys.

    layer_keys = ("wqkv", "bqkv", "wo", "bo", "ln1w", "ln1b",
                  "w1", "b1", "w2", "b2", "ln2w", "ln2b")
    layer_weights = [params[k] for k in layer_keys]

    # FFN hidden tile so the (Bb*S, 4E) h1 intermediate is never materialized.
    ffn_tile = 4 * E
    for cand in (512, 256, 128):
        if (4 * E) % cand == 0 and 4 * E > cand:
            ffn_tile = cand
            break

    kernel = functools.partial(
        fused_kernel, num_heads=num_heads, head_dim=head_dim,
        bb=Bb, seq=S, emb=E, num_layers=L, ffn_tile=ffn_tile)

    def _whole(arr):
        # Grid-invariant full block -> fetched once per call, VMEM-resident.
        # TODO(synk): for very large L*E^2 that exceeds v7x's 64 MiB VMEM, fall
        # back to streaming per-layer blocks over a layer grid axis.
        return pl.BlockSpec(arr.shape, lambda b, nd=arr.ndim: (0,) * nd)

    in_specs = ([pl.BlockSpec((Bb, S, E), lambda b: (b, 0, 0)),    # src
                 pl.BlockSpec((Bb, 1, S), lambda b: (b, 0, 0))]    # key-mask bias
                + [_whole(w) for w in layer_weights]
                + [pl.BlockSpec((1, E), lambda b: (0, 0)),         # fc_w
                   pl.BlockSpec((1, 1), lambda b: (0, 0))])        # fc_b

    out_specs = pl.BlockSpec((1, 1, Bb * S), lambda b: (b, 0, 0))  # lane-dense
    out_shape = jax.ShapeDtypeStruct((n_blocks, 1, Bb * S), jnp.float32)

    # Explicit VMEM budget (fails loudly at compile time instead of spilling;
    # clamped to v7x's 64 MiB physical VMEM per TensorCore).
    def nbytes(a):
        return a.size * a.dtype.itemsize
    blk = 2 * (Bb * S * E * 4 + Bb * S * 4 + Bb * S * 4)
    wts = 2 * (sum(nbytes(w) for w in layer_weights) + E * 4 + 4)
    inter = Bb * S * (3 * E + 3 * E + ffn_tile + E) * 4
    vmem_limit = int(min(64 * 2 ** 20,
                         max(32 * 2 ** 20, blk + wts + inter + (4 << 20))))

    M = B * S
    flops = (L * (2 * M * E * 3 * E + 2 * M * E * E + 4 * M * E * 4 * E
                  + 4 * B * num_heads * S * S * head_dim) + 2 * M * E)
    bytes_accessed = int(nbytes(src) + nbytes(bias) + 4 * M
                         + sum(nbytes(w) for w in layer_weights) + 4 * (E + 1))
    cost = pl.CostEstimate(flops=flops,
                           transcendentals=L * B * num_heads * S * S,
                           bytes_accessed=bytes_accessed)

    out = pl.pallas_call(
        kernel,
        out_shape=out_shape,
        grid_spec=pltpu.PrefetchScalarGridSpec(
            num_scalar_prefetch=0,
            grid=(n_blocks,),
            in_specs=in_specs,
            out_specs=out_specs,
        ),
        compiler_params=pltpu.CompilerParams(
            dimension_semantics=("parallel",),
            vmem_limit_bytes=vmem_limit),
        cost_estimate=cost,
    )(src, bias, *layer_weights, params["fc_w"], params["fc_b"])

    # restore the module's (B, S, 1) output shape
    return out.reshape(B, S)[..., None]


# ----------------------------------------------------------------------------
if __name__ == "__main__":
    B, S = 2, 8
    num_categories, num_index = 10, 12
    embedding_dim, num_heads, num_layers = 32, 4, 2

    key = jax.random.PRNGKey(0)
    k_par, k_val, k_cat, k_step, k_start = jax.random.split(key, 5)

    params = init_params(k_par, num_categories, num_index, embedding_dim,
                         num_heads, num_layers)

    src_val = jax.random.normal(k_val, (B, S), jnp.float32)
    # sprinkle a few NaNs (padding), but never a fully-masked row
    src_val = src_val.at[0, 3].set(jnp.nan).at[1, 5].set(jnp.nan)
    src_cat = jax.random.randint(k_cat, (B, S), 0, num_categories, jnp.int32)
    idx_step = jax.random.randint(k_step, (B,), 0, num_index, jnp.int32)
    idx_start = jax.random.randint(k_start, (B,), 0, num_index, jnp.int32)

    out = graph_transformer_vals(params, src_val, src_cat, idx_step, idx_start,
                                 num_heads)
    out = jax.block_until_ready(out)

    assert out.shape == (B, S, 1), out.shape
    assert bool(jnp.all(jnp.isfinite(out))), "non-finite output"
    print("KERNEL_OK")
</pallas_src>

<mosaic_0001>
module attributes {stable_mosaic.version = 11 : i64} {
  func.func @fused_kernel(%arg0: i32, %arg1: memref<1x8x32xf32, #tpu.memory_space<vmem>>, %arg2: memref<1x1x8xf32, #tpu.memory_space<vmem>>, %arg3: memref<2x32x96xbf16, #tpu.memory_space<vmem>>, %arg4: memref<2x1x96xf32, #tpu.memory_space<vmem>>, %arg5: memref<2x32x32xbf16, #tpu.memory_space<vmem>>, %arg6: memref<2x1x32xf32, #tpu.memory_space<vmem>>, %arg7: memref<2x1x32xf32, #tpu.memory_space<vmem>>, %arg8: memref<2x1x32xf32, #tpu.memory_space<vmem>>, %arg9: memref<2x32x128xbf16, #tpu.memory_space<vmem>>, %arg10: memref<2x1x128xf32, #tpu.memory_space<vmem>>, %arg11: memref<2x128x32xbf16, #tpu.memory_space<vmem>>, %arg12: memref<2x1x32xf32, #tpu.memory_space<vmem>>, %arg13: memref<2x1x32xf32, #tpu.memory_space<vmem>>, %arg14: memref<2x1x32xf32, #tpu.memory_space<vmem>>, %arg15: memref<1x32xf32, #tpu.memory_space<vmem>>, %arg16: memref<1x1xf32, #tpu.memory_space<vmem>>, %arg17: memref<1x1x8xf32, #tpu.memory_space<vmem>>) attributes {dimension_semantics = [#tpu.dimension_semantics<parallel>], iteration_bounds = array<i64: 2>, scalar_prefetch = 0 : i64, scratch_operands = 0 : i64, tpu.core_type = #tpu.core_type<tc>, window_params = [{transform_indices = @transform_0, window_bounds = array<i64: 1, 8, 32>}, {transform_indices = @transform_1, window_bounds = array<i64: 1, 1, 8>}, {pipeline_mode = #tpu.pipeline_mode<synchronous>, transform_indices = @transform_2, window_bounds = array<i64: 2, 32, 96>}, {pipeline_mode = #tpu.pipeline_mode<synchronous>, transform_indices = @transform_3, window_bounds = array<i64: 2, 1, 96>}, {pipeline_mode = #tpu.pipeline_mode<synchronous>, transform_indices = @transform_4, window_bounds = array<i64: 2, 32, 32>}, {pipeline_mode = #tpu.pipeline_mode<synchronous>, transform_indices = @transform_5, window_bounds = array<i64: 2, 1, 32>}, {pipeline_mode = #tpu.pipeline_mode<synchronous>, transform_indices = @transform_6, window_bounds = array<i64: 2, 1, 32>}, {pipeline_mode = #tpu.pipeline_mode<synchronous>, transform_indices = @transform_7, window_bounds = array<i64: 2, 1, 32>}, {pipeline_mode = #tpu.pipeline_mode<synchronous>, transform_indices = @transform_8, window_bounds = array<i64: 2, 32, 128>}, {pipeline_mode = #tpu.pipeline_mode<synchronous>, transform_indices = @transform_9, window_bounds = array<i64: 2, 1, 128>}, {pipeline_mode = #tpu.pipeline_mode<synchronous>, transform_indices = @transform_10, window_bounds = array<i64: 2, 128, 32>}, {pipeline_mode = #tpu.pipeline_mode<synchronous>, transform_indices = @transform_11, window_bounds = array<i64: 2, 1, 32>}, {pipeline_mode = #tpu.pipeline_mode<synchronous>, transform_indices = @transform_12, window_bounds = array<i64: 2, 1, 32>}, {pipeline_mode = #tpu.pipeline_mode<synchronous>, transform_indices = @transform_13, window_bounds = array<i64: 2, 1, 32>}, {pipeline_mode = #tpu.pipeline_mode<synchronous>, transform_indices = @transform_14, window_bounds = array<i64: 1, 32>}, {pipeline_mode = #tpu.pipeline_mode<synchronous>, transform_indices = @transform_15, window_bounds = array<i64: 1, 1>}, {transform_indices = @transform_16, window_bounds = array<i64: 1, 1, 8>}]} {
    %c0 = arith.constant 0 : index
    %c0_0 = arith.constant 0 : index
    %c0_1 = arith.constant 0 : index
    %0 = vector.load %arg1[%c0, %c0_0, %c0_1] : memref<1x8x32xf32, #tpu.memory_space<vmem>>, vector<1x8x32xf32>
    %1 = vector.shape_cast %0 : vector<1x8x32xf32> to vector<8x32xf32>
    %c0_2 = arith.constant 0 : index
    %c0_3 = arith.constant 0 : index
    %c0_4 = arith.constant 0 : index
    %2 = vector.load %arg2[%c0_2, %c0_3, %c0_4] : memref<1x1x8xf32, #tpu.memory_space<vmem>>, vector<1x1x8xf32>
    %c0_i32 = arith.constant 0 : i32
    %c2_i32 = arith.constant 2 : i32
    %3 = arith.addi %c0_i32, %c2_i32 : i32
    %c1_i32 = arith.constant 1 : i32
    %4 = scf.for %arg18 = %c0_i32 to %3 step %c1_i32 iter_args(%arg19 = %1) -> (vector<8x32xf32>)  : i32 {
      %15 = arith.index_cast %arg18 : i32 to index
      %c0_13 = arith.constant 0 : index
      %c0_14 = arith.constant 0 : index
      %16 = vector.load %arg3[%15, %c0_13, %c0_14] : memref<2x32x96xbf16, #tpu.memory_space<vmem>>, vector<1x32x96xbf16>
      %17 = vector.shape_cast %16 : vector<1x32x96xbf16> to vector<32x96xbf16>
      %18 = arith.index_cast %arg18 : i32 to index
      %c0_15 = arith.constant 0 : index
      %c0_16 = arith.constant 0 : index
      %19 = vector.load %arg4[%18, %c0_15, %c0_16] : memref<2x1x96xf32, #tpu.memory_space<vmem>>, vector<1x1x96xf32>
      %20 = vector.shape_cast %19 : vector<1x1x96xf32> to vector<1x96xf32>
      %21 = arith.index_cast %arg18 : i32 to index
      %c0_17 = arith.constant 0 : index
      %c0_18 = arith.constant 0 : index
      %22 = vector.load %arg5[%21, %c0_17, %c0_18] : memref<2x32x32xbf16, #tpu.memory_space<vmem>>, vector<1x32x32xbf16>
      %23 = vector.shape_cast %22 : vector<1x32x32xbf16> to vector<32x32xbf16>
      %24 = arith.index_cast %arg18 : i32 to index
      %c0_19 = arith.constant 0 : index
      %c0_20 = arith.constant 0 : index
      %25 = vector.load %arg6[%24, %c0_19, %c0_20] : memref<2x1x32xf32, #tpu.memory_space<vmem>>, vector<1x1x32xf32>
      %26 = vector.shape_cast %25 : vector<1x1x32xf32> to vector<1x32xf32>
      %27 = arith.index_cast %arg18 : i32 to index
      %c0_21 = arith.constant 0 : index
      %c0_22 = arith.constant 0 : index
      %28 = vector.load %arg9[%27, %c0_21, %c0_22] : memref<2x32x128xbf16, #tpu.memory_space<vmem>>, vector<1x32x128xbf16>
      %29 = vector.shape_cast %28 : vector<1x32x128xbf16> to vector<32x128xbf16>
      %30 = arith.index_cast %arg18 : i32 to index
      %c0_23 = arith.constant 0 : index
      %c0_24 = arith.constant 0 : index
      %31 = vector.load %arg10[%30, %c0_23, %c0_24] : memref<2x1x128xf32, #tpu.memory_space<vmem>>, vector<1x1x128xf32>
      %32 = vector.shape_cast %31 : vector<1x1x128xf32> to vector<1x128xf32>
      %33 = arith.index_cast %arg18 : i32 to index
      %c0_25 = arith.constant 0 : index
      %c0_26 = arith.constant 0 : index
      %34 = vector.load %arg11[%33, %c0_25, %c0_26] : memref<2x128x32xbf16, #tpu.memory_space<vmem>>, vector<1x128x32xbf16>
      %35 = vector.shape_cast %34 : vector<1x128x32xbf16> to vector<128x32xbf16>
      %36 = arith.index_cast %arg18 : i32 to index
      %c0_27 = arith.constant 0 : index
      %c0_28 = arith.constant 0 : index
      %37 = vector.load %arg12[%36, %c0_27, %c0_28] : memref<2x1x32xf32, #tpu.memory_space<vmem>>, vector<1x1x32xf32>
      %38 = vector.shape_cast %37 : vector<1x1x32xf32> to vector<1x32xf32>
      %39 = arith.truncf %arg19 : vector<8x32xf32> to vector<8x32xbf16>
      %cst_29 = arith.constant dense<0.000000e+00> : vector<8x96xf32>
      %40 = tpu.matmul %39, %17, %cst_29 {dimension_numbers = #tpu.dot_dimension_numbers<[1], [0], [0], [1], [0, 0, 1, 1], [], []>} : vector<8x32xbf16>, vector<32x96xbf16>, vector<8x96xf32> -> vector<8x96xf32>
      %41 = vector.broadcast %20 : vector<1x96xf32> to vector<8x96xf32>
      %42 = arith.addf %40, %41 : vector<8x96xf32>
      %cst_30 = arith.constant 0.000000e+00 : f32
      %43 = vector.broadcast %cst_30 : f32 to vector<8x32xf32>
      %44 = vector.extract_strided_slice %42 {offsets = [0, 0], sizes = [8, 8], strides = [1, 1]} : vector<8x96xf32> to vector<8x8xf32>
      %45 = arith.truncf %44 : vector<8x8xf32> to vector<8x8xbf16>
      %46 = vector.shape_cast %45 : vector<8x8xbf16> to vector<1x8x8xbf16>
      %47 = vector.extract_strided_slice %42 {offsets = [0, 32], sizes = [8, 8], strides = [1, 1]} : vector<8x96xf32> to vector<8x8xf32>
      %48 = arith.truncf %47 : vector<8x8xf32> to vector<8x8xbf16>
      %49 = vector.shape_cast %48 : vector<8x8xbf16> to vector<1x8x8xbf16>
      %50 = vector.extract_strided_slice %42 {offsets = [0, 64], sizes = [8, 8], strides = [1, 1]} : vector<8x96xf32> to vector<8x8xf32>
      %51 = arith.truncf %50 : vector<8x8xf32> to vector<8x8xbf16>
      %52 = vector.shape_cast %51 : vector<8x8xbf16> to vector<1x8x8xbf16>
      "tpu.trace_start"() <{level = 10 : i32, message = "bqd,bkd->bqk"}> : () -> ()
      %cst_31 = arith.constant dense<0.000000e+00> : vector<1x8x8xf32>
      %53 = tpu.matmul %46, %49, %cst_31 {dimension_numbers = #tpu.dot_dimension_numbers<[2], [2], [1], [1], [0, 0, 0, 1, 1, 1], [0], [0]>} : vector<1x8x8xbf16>, vector<1x8x8xbf16>, vector<1x8x8xf32> -> vector<1x8x8xf32>
      "tpu.trace_stop"() : () -> ()
      %54 = vector.broadcast %2 : vector<1x1x8xf32> to vector<1x8x8xf32>
      %55 = arith.addf %53, %54 : vector<1x8x8xf32>
      %cst_32 = arith.constant dense<0xFF800000> : vector<1x8xf32>
      %56 = vector.multi_reduction <maximumf>, %55, %cst_32 [2] : vector<1x8x8xf32> to vector<1x8xf32>
      %57 = vector.shape_cast %56 : vector<1x8xf32> to vector<1x8x1xf32>
      %58 = vector.broadcast %57 : vector<1x8x1xf32> to vector<1x8x8xf32>
      %59 = arith.subf %55, %58 : vector<1x8x8xf32>
      %60 = math.exp %59 : vector<1x8x8xf32>
      %cst_33 = arith.constant dense<0.000000e+00> : vector<1x8xf32>
      %61 = vector.multi_reduction <add>, %60, %cst_33 [2] : vector<1x8x8xf32> to vector<1x8xf32>
      %62 = vector.shape_cast %61 : vector<1x8xf32> to vector<1x8x1xf32>
      %63 = tpu.reciprocal %62 {approx = true} : vector<1x8x1xf32> -> vector<1x8x1xf32>
      %64 = vector.broadcast %63 : vector<1x8x1xf32> to vector<1x8x8xf32>
      %65 = arith.mulf %60, %64 : vector<1x8x8xf32>
      %66 = arith.truncf %65 : vector<1x8x8xf32> to vector<1x8x8xbf16>
      "tpu.trace_start"() <{level = 10 : i32, message = "bqk,bkd->bqd"}> : () -> ()
      %cst_34 = arith.constant dense<0.000000e+00> : vector<1x8x8xf32>
      %67 = tpu.matmul %66, %52, %cst_34 {dimension_numbers = #tpu.dot_dimension_numbers<[2], [1], [1], [2], [0, 0, 0, 1, 1, 2], [0], [0]>} : vector<1x8x8xbf16>, vector<1x8x8xbf16>, vector<1x8x8xf32> -> vector<1x8x8xf32>
      "tpu.trace_stop"() : () -> ()
      %68 = vector.shape_cast %67 : vector<1x8x8xf32> to vector<8x8xf32>
      %69 = arith.truncf %68 : vector<8x8xf32> to vector<8x8xbf16>
      %70 = vector.extract_strided_slice %23 {offsets = [0, 0], sizes = [8, 32], strides = [1, 1]} : vector<32x32xbf16> to vector<8x32xbf16>
      %cst_35 = arith.constant dense<0.000000e+00> : vector<8x32xf32>
      %71 = tpu.matmul %69, %70, %cst_35 {dimension_numbers = #tpu.dot_dimension_numbers<[1], [0], [0], [1], [0, 0, 1, 1], [], []>} : vector<8x8xbf16>, vector<8x32xbf16>, vector<8x32xf32> -> vector<8x32xf32>
      %72 = arith.addf %43, %71 : vector<8x32xf32>
      %73 = vector.extract_strided_slice %42 {offsets = [0, 8], sizes = [8, 8], strides = [1, 1]} : vector<8x96xf32> to vector<8x8xf32>
      %74 = arith.truncf %73 : vector<8x8xf32> to vector<8x8xbf16>
      %75 = vector.shape_cast %74 : vector<8x8xbf16> to vector<1x8x8xbf16>
      %76 = vector.extract_strided_slice %42 {offsets = [0, 40], sizes = [8, 8], strides = [1, 1]} : vector<8x96xf32> to vector<8x8xf32>
      %77 = arith.truncf %76 : vector<8x8xf32> to vector<8x8xbf16>
      %78 = vector.shape_cast %77 : vector<8x8xbf16> to vector<1x8x8xbf16>
      %79 = vector.extract_strided_slice %42 {offsets = [0, 72], sizes = [8, 8], strides = [1, 1]} : vector<8x96xf32> to vector<8x8xf32>
      %80 = arith.truncf %79 : vector<8x8xf32> to vector<8x8xbf16>
      %81 = vector.shape_cast %80 : vector<8x8xbf16> to vector<1x8x8xbf16>
      "tpu.trace_start"() <{level = 10 : i32, message = "bqd,bkd->bqk"}> : () -> ()
      %cst_36 = arith.constant dense<0.000000e+00> : vector<1x8x8xf32>
      %82 = tpu.matmul %75, %78, %cst_36 {dimension_numbers = #tpu.dot_dimension_numbers<[2], [2], [1], [1], [0, 0, 0, 1, 1, 1], [0], [0]>} : vector<1x8x8xbf16>, vector<1x8x8xbf16>, vector<1x8x8xf32> -> vector<1x8x8xf32>
      "tpu.trace_stop"() : () -> ()
      %83 = vector.broadcast %2 : vector<1x1x8xf32> to vector<1x8x8xf32>
      %84 = arith.addf %82, %83 : vector<1x8x8xf32>
      %cst_37 = arith.constant dense<0xFF800000> : vector<1x8xf32>
      %85 = vector.multi_reduction <maximumf>, %84, %cst_37 [2] : vector<1x8x8xf32> to vector<1x8xf32>
      %86 = vector.shape_cast %85 : vector<1x8xf32> to vector<1x8x1xf32>
      %87 = vector.broadcast %86 : vector<1x8x1xf32> to vector<1x8x8xf32>
      %88 = arith.subf %84, %87 : vector<1x8x8xf32>
      %89 = math.exp %88 : vector<1x8x8xf32>
      %cst_38 = arith.constant dense<0.000000e+00> : vector<1x8xf32>
      %90 = vector.multi_reduction <add>, %89, %cst_38 [2] : vector<1x8x8xf32> to vector<1x8xf32>
      %91 = vector.shape_cast %90 : vector<1x8xf32> to vector<1x8x1xf32>
      %92 = tpu.reciprocal %91 {approx = true} : vector<1x8x1xf32> -> vector<1x8x1xf32>
      %93 = vector.broadcast %92 : vector<1x8x1xf32> to vector<1x8x8xf32>
      %94 = arith.mulf %89, %93 : vector<1x8x8xf32>
      %95 = arith.truncf %94 : vector<1x8x8xf32> to vector<1x8x8xbf16>
      "tpu.trace_start"() <{level = 10 : i32, message = "bqk,bkd->bqd"}> : () -> ()
      %cst_39 = arith.constant dense<0.000000e+00> : vector<1x8x8xf32>
      %96 = tpu.matmul %95, %81, %cst_39 {dimension_numbers = #tpu.dot_dimension_numbers<[2], [1], [1], [2], [0, 0, 0, 1, 1, 2], [0], [0]>} : vector<1x8x8xbf16>, vector<1x8x8xbf16>, vector<1x8x8xf32> -> vector<1x8x8xf32>
      "tpu.trace_stop"() : () -> ()
      %97 = vector.shape_cast %96 : vector<1x8x8xf32> to vector<8x8xf32>
      %98 = arith.truncf %97 : vector<8x8xf32> to vector<8x8xbf16>
      %99 = vector.extract_strided_slice %23 {offsets = [8, 0], sizes = [8, 32], strides = [1, 1]} : vector<32x32xbf16> to vector<8x32xbf16>
      %cst_40 = arith.constant dense<0.000000e+00> : vector<8x32xf32>
      %100 = tpu.matmul %98, %99, %cst_40 {dimension_numbers = #tpu.dot_dimension_numbers<[1], [0], [0], [1], [0, 0, 1, 1], [], []>} : vector<8x8xbf16>, vector<8x32xbf16>, vector<8x32xf32> -> vector<8x32xf32>
      %101 = arith.addf %72, %100 : vector<8x32xf32>
      %102 = vector.extract_strided_slice %42 {offsets = [0, 16], sizes = [8, 8], strides = [1, 1]} : vector<8x96xf32> to vector<8x8xf32>
      %103 = arith.truncf %102 : vector<8x8xf32> to vector<8x8xbf16>
      %104 = vector.shape_cast %103 : vector<8x8xbf16> to vector<1x8x8xbf16>
      %105 = vector.extract_strided_slice %42 {offsets = [0, 48], sizes = [8, 8], strides = [1, 1]} : vector<8x96xf32> to vector<8x8xf32>
      %106 = arith.truncf %105 : vector<8x8xf32> to vector<8x8xbf16>
      %107 = vector.shape_cast %106 : vector<8x8xbf16> to vector<1x8x8xbf16>
      %108 = vector.extract_strided_slice %42 {offsets = [0, 80], sizes = [8, 8], strides = [1, 1]} : vector<8x96xf32> to vector<8x8xf32>
      %109 = arith.truncf %108 : vector<8x8xf32> to vector<8x8xbf16>
      %110 = vector.shape_cast %109 : vector<8x8xbf16> to vector<1x8x8xbf16>
      "tpu.trace_start"() <{level = 10 : i32, message = "bqd,bkd->bqk"}> : () -> ()
      %cst_41 = arith.constant dense<0.000000e+00> : vector<1x8x8xf32>
      %111 = tpu.matmul %104, %107, %cst_41 {dimension_numbers = #tpu.dot_dimension_numbers<[2], [2], [1], [1], [0, 0, 0, 1, 1, 1], [0], [0]>} : vector<1x8x8xbf16>, vector<1x8x8xbf16>, vector<1x8x8xf32> -> vector<1x8x8xf32>
      "tpu.trace_stop"() : () -> ()
      %112 = vector.broadcast %2 : vector<1x1x8xf32> to vector<1x8x8xf32>
      %113 = arith.addf %111, %112 : vector<1x8x8xf32>
      %cst_42 = arith.constant dense<0xFF800000> : vector<1x8xf32>
      %114 = vector.multi_reduction <maximumf>, %113, %cst_42 [2] : vector<1x8x8xf32> to vector<1x8xf32>
      %115 = vector.shape_cast %114 : vector<1x8xf32> to vector<1x8x1xf32>
      %116 = vector.broadcast %115 : vector<1x8x1xf32> to vector<1x8x8xf32>
      %117 = arith.subf %113, %116 : vector<1x8x8xf32>
      %118 = math.exp %117 : vector<1x8x8xf32>
      %cst_43 = arith.constant dense<0.000000e+00> : vector<1x8xf32>
      %119 = vector.multi_reduction <add>, %118, %cst_43 [2] : vector<1x8x8xf32> to vector<1x8xf32>
      %120 = vector.shape_cast %119 : vector<1x8xf32> to vector<1x8x1xf32>
      %121 = tpu.reciprocal %120 {approx = true} : vector<1x8x1xf32> -> vector<1x8x1xf32>
      %122 = vector.broadcast %121 : vector<1x8x1xf32> to vector<1x8x8xf32>
      %123 = arith.mulf %118, %122 : vector<1x8x8xf32>
      %124 = arith.truncf %123 : vector<1x8x8xf32> to vector<1x8x8xbf16>
      "tpu.trace_start"() <{level = 10 : i32, message = "bqk,bkd->bqd"}> : () -> ()
      %cst_44 = arith.constant dense<0.000000e+00> : vector<1x8x8xf32>
      %125 = tpu.matmul %124, %110, %cst_44 {dimension_numbers = #tpu.dot_dimension_numbers<[2], [1], [1], [2], [0, 0, 0, 1, 1, 2], [0], [0]>} : vector<1x8x8xbf16>, vector<1x8x8xbf16>, vector<1x8x8xf32> -> vector<1x8x8xf32>
      "tpu.trace_stop"() : () -> ()
      %126 = vector.shape_cast %125 : vector<1x8x8xf32> to vector<8x8xf32>
      %127 = arith.truncf %126 : vector<8x8xf32> to vector<8x8xbf16>
      %128 = vector.extract_strided_slice %23 {offsets = [16, 0], sizes = [8, 32], strides = [1, 1]} : vector<32x32xbf16> to vector<8x32xbf16>
      %cst_45 = arith.constant dense<0.000000e+00> : vector<8x32xf32>
      %129 = tpu.matmul %127, %128, %cst_45 {dimension_numbers = #tpu.dot_dimension_numbers<[1], [0], [0], [1], [0, 0, 1, 1], [], []>} : vector<8x8xbf16>, vector<8x32xbf16>, vector<8x32xf32> -> vector<8x32xf32>
      %130 = arith.addf %101, %129 : vector<8x32xf32>
      %131 = vector.extract_strided_slice %42 {offsets = [0, 24], sizes = [8, 8], strides = [1, 1]} : vector<8x96xf32> to vector<8x8xf32>
      %132 = arith.truncf %131 : vector<8x8xf32> to vector<8x8xbf16>
      %133 = vector.shape_cast %132 : vector<8x8xbf16> to vector<1x8x8xbf16>
      %134 = vector.extract_strided_slice %42 {offsets = [0, 56], sizes = [8, 8], strides = [1, 1]} : vector<8x96xf32> to vector<8x8xf32>
      %135 = arith.truncf %134 : vector<8x8xf32> to vector<8x8xbf16>
      %136 = vector.shape_cast %135 : vector<8x8xbf16> to vector<1x8x8xbf16>
      %137 = vector.extract_strided_slice %42 {offsets = [0, 88], sizes = [8, 8], strides = [1, 1]} : vector<8x96xf32> to vector<8x8xf32>
      %138 = arith.truncf %137 : vector<8x8xf32> to vector<8x8xbf16>
      %139 = vector.shape_cast %138 : vector<8x8xbf16> to vector<1x8x8xbf16>
      "tpu.trace_start"() <{level = 10 : i32, message = "bqd,bkd->bqk"}> : () -> ()
      %cst_46 = arith.constant dense<0.000000e+00> : vector<1x8x8xf32>
      %140 = tpu.matmul %133, %136, %cst_46 {dimension_numbers = #tpu.dot_dimension_numbers<[2], [2], [1], [1], [0, 0, 0, 1, 1, 1], [0], [0]>} : vector<1x8x8xbf16>, vector<1x8x8xbf16>, vector<1x8x8xf32> -> vector<1x8x8xf32>
      "tpu.trace_stop"() : () -> ()
      %141 = vector.broadcast %2 : vector<1x1x8xf32> to vector<1x8x8xf32>
      %142 = arith.addf %140, %141 : vector<1x8x8xf32>
      %cst_47 = arith.constant dense<0xFF800000> : vector<1x8xf32>
      %143 = vector.multi_reduction <maximumf>, %142, %cst_47 [2] : vector<1x8x8xf32> to vector<1x8xf32>
      %144 = vector.shape_cast %143 : vector<1x8xf32> to vector<1x8x1xf32>
      %145 = vector.broadcast %144 : vector<1x8x1xf32> to vector<1x8x8xf32>
      %146 = arith.subf %142, %145 : vector<1x8x8xf32>
      %147 = math.exp %146 : vector<1x8x8xf32>
      %cst_48 = arith.constant dense<0.000000e+00> : vector<1x8xf32>
      %148 = vector.multi_reduction <add>, %147, %cst_48 [2] : vector<1x8x8xf32> to vector<1x8xf32>
      %149 = vector.shape_cast %148 : vector<1x8xf32> to vector<1x8x1xf32>
      %150 = tpu.reciprocal %149 {approx = true} : vector<1x8x1xf32> -> vector<1x8x1xf32>
      %151 = vector.broadcast %150 : vector<1x8x1xf32> to vector<1x8x8xf32>
      %152 = arith.mulf %147, %151 : vector<1x8x8xf32>
      %153 = arith.truncf %152 : vector<1x8x8xf32> to vector<1x8x8xbf16>
      "tpu.trace_start"() <{level = 10 : i32, message = "bqk,bkd->bqd"}> : () -> ()
      %cst_49 = arith.constant dense<0.000000e+00> : vector<1x8x8xf32>
      %154 = tpu.matmul %153, %139, %cst_49 {dimension_numbers = #tpu.dot_dimension_numbers<[2], [1], [1], [2], [0, 0, 0, 1, 1, 2], [0], [0]>} : vector<1x8x8xbf16>, vector<1x8x8xbf16>, vector<1x8x8xf32> -> vector<1x8x8xf32>
      "tpu.trace_stop"() : () -> ()
      %155 = vector.shape_cast %154 : vector<1x8x8xf32> to vector<8x8xf32>
      %156 = arith.truncf %155 : vector<8x8xf32> to vector<8x8xbf16>
      %157 = vector.extract_strided_slice %23 {offsets = [24, 0], sizes = [8, 32], strides = [1, 1]} : vector<32x32xbf16> to vector<8x32xbf16>
      %cst_50 = arith.constant dense<0.000000e+00> : vector<8x32xf32>
      %158 = tpu.matmul %156, %157, %cst_50 {dimension_numbers = #tpu.dot_dimension_numbers<[1], [0], [0], [1], [0, 0, 1, 1], [], []>} : vector<8x8xbf16>, vector<8x32xbf16>, vector<8x32xf32> -> vector<8x32xf32>
      %159 = arith.addf %130, %158 : vector<8x32xf32>
      %160 = vector.broadcast %26 : vector<1x32xf32> to vector<8x32xf32>
      %161 = arith.addf %159, %160 : vector<8x32xf32>
      %162 = arith.addf %arg19, %161 : vector<8x32xf32>
      %163 = arith.index_cast %arg18 : i32 to index
      %c0_51 = arith.constant 0 : index
      %c0_52 = arith.constant 0 : index
      %164 = vector.load %arg7[%163, %c0_51, %c0_52] : memref<2x1x32xf32, #tpu.memory_space<vmem>>, vector<1x1x32xf32>
      %165 = vector.shape_cast %164 : vector<1x1x32xf32> to vector<1x32xf32>
      %166 = arith.index_cast %arg18 : i32 to index
      %c0_53 = arith.constant 0 : index
      %c0_54 = arith.constant 0 : index
      %167 = vector.load %arg8[%166, %c0_53, %c0_54] : memref<2x1x32xf32, #tpu.memory_space<vmem>>, vector<1x1x32xf32>
      %168 = vector.shape_cast %167 : vector<1x1x32xf32> to vector<1x32xf32>
      %cst_55 = arith.constant dense<0.000000e+00> : vector<8xf32>
      %169 = vector.multi_reduction <add>, %162, %cst_55 [1] : vector<8x32xf32> to vector<8xf32>
      %170 = vector.shape_cast %169 : vector<8xf32> to vector<8x1xf32>
      %cst_56 = arith.constant 3.200000e+01 : f32
      %171 = vector.broadcast %cst_56 : f32 to vector<8x1xf32>
      %172 = arith.divf %170, %171 : vector<8x1xf32>
      %173 = vector.broadcast %172 : vector<8x1xf32> to vector<8x32xf32>
      %174 = arith.subf %162, %173 : vector<8x32xf32>
      %175 = arith.mulf %174, %174 : vector<8x32xf32>
      %cst_57 = arith.constant dense<0.000000e+00> : vector<8xf32>
      %176 = vector.multi_reduction <add>, %175, %cst_57 [1] : vector<8x32xf32> to vector<8xf32>
      %177 = vector.shape_cast %176 : vector<8xf32> to vector<8x1xf32>
      %cst_58 = arith.constant 3.200000e+01 : f32
      %178 = vector.broadcast %cst_58 : f32 to vector<8x1xf32>
      %179 = arith.divf %177, %178 : vector<8x1xf32>
      %cst_59 = arith.constant 9.99999974E-6 : f32
      %180 = vector.broadcast %cst_59 : f32 to vector<8x1xf32>
      %181 = arith.addf %179, %180 : vector<8x1xf32>
      %182 = math.rsqrt %181 : vector<8x1xf32>
      %183 = vector.broadcast %182 : vector<8x1xf32> to vector<8x32xf32>
      %184 = arith.mulf %174, %183 : vector<8x32xf32>
      %185 = vector.broadcast %165 : vector<1x32xf32> to vector<8x32xf32>
      %186 = arith.mulf %184, %185 : vector<8x32xf32>
      %187 = vector.broadcast %168 : vector<1x32xf32> to vector<8x32xf32>
      %188 = arith.addf %186, %187 : vector<8x32xf32>
      %189 = arith.truncf %188 : vector<8x32xf32> to vector<8x32xbf16>
      %cst_60 = arith.constant 0.000000e+00 : f32
      %190 = vector.broadcast %cst_60 : f32 to vector<8x32xf32>
      %cst_61 = arith.constant dense<0.000000e+00> : vector<8x128xf32>
      %191 = tpu.matmul %189, %29, %cst_61 {dimension_numbers = #tpu.dot_dimension_numbers<[1], [0], [0], [1], [0, 0, 1, 1], [], []>} : vector<8x32xbf16>, vector<32x128xbf16>, vector<8x128xf32> -> vector<8x128xf32>
      %192 = vector.broadcast %32 : vector<1x128xf32> to vector<8x128xf32>
      %193 = arith.addf %191, %192 : vector<8x128xf32>
      %cst_62 = arith.constant 0.000000e+00 : f32
      %194 = vector.broadcast %cst_62 : f32 to vector<8x128xf32>
      %195 = arith.maximumf %193, %194 : vector<8x128xf32>
      %196 = arith.truncf %195 : vector<8x128xf32> to vector<8x128xbf16>
      %cst_63 = arith.constant dense<0.000000e+00> : vector<8x32xf32>
      %197 = tpu.matmul %196, %35, %cst_63 {dimension_numbers = #tpu.dot_dimension_numbers<[1], [0], [0], [1], [0, 0, 1, 1], [], []>} : vector<8x128xbf16>, vector<128x32xbf16>, vector<8x32xf32> -> vector<8x32xf32>
      %198 = arith.addf %190, %197 : vector<8x32xf32>
      %199 = vector.broadcast %38 : vector<1x32xf32> to vector<8x32xf32>
      %200 = arith.addf %198, %199 : vector<8x32xf32>
      %201 = arith.addf %188, %200 : vector<8x32xf32>
      %202 = arith.index_cast %arg18 : i32 to index
      %c0_64 = arith.constant 0 : index
      %c0_65 = arith.constant 0 : index
      %203 = vector.load %arg13[%202, %c0_64, %c0_65] : memref<2x1x32xf32, #tpu.memory_space<vmem>>, vector<1x1x32xf32>
      %204 = vector.shape_cast %203 : vector<1x1x32xf32> to vector<1x32xf32>
      %205 = arith.index_cast %arg18 : i32 to index
      %c0_66 = arith.constant 0 : index
      %c0_67 = arith.constant 0 : index
      %206 = vector.load %arg14[%205, %c0_66, %c0_67] : memref<2x1x32xf32, #tpu.memory_space<vmem>>, vector<1x1x32xf32>
      %207 = vector.shape_cast %206 : vector<1x1x32xf32> to vector<1x32xf32>
      %cst_68 = arith.constant dense<0.000000e+00> : vector<8xf32>
      %208 = vector.multi_reduction <add>, %201, %cst_68 [1] : vector<8x32xf32> to vector<8xf32>
      %209 = vector.shape_cast %208 : vector<8xf32> to vector<8x1xf32>
      %cst_69 = arith.constant 3.200000e+01 : f32
      %210 = vector.broadcast %cst_69 : f32 to vector<8x1xf32>
      %211 = arith.divf %209, %210 : vector<8x1xf32>
      %212 = vector.broadcast %211 : vector<8x1xf32> to vector<8x32xf32>
      %213 = arith.subf %201, %212 : vector<8x32xf32>
      %214 = arith.mulf %213, %213 : vector<8x32xf32>
      %cst_70 = arith.constant dense<0.000000e+00> : vector<8xf32>
      %215 = vector.multi_reduction <add>, %214, %cst_70 [1] : vector<8x32xf32> to vector<8xf32>
      %216 = vector.shape_cast %215 : vector<8xf32> to vector<8x1xf32>
      %cst_71 = arith.constant 3.200000e+01 : f32
      %217 = vector.broadcast %cst_71 : f32 to vector<8x1xf32>
      %218 = arith.divf %216, %217 : vector<8x1xf32>
      %cst_72 = arith.constant 9.99999974E-6 : f32
      %219 = vector.broadcast %cst_72 : f32 to vector<8x1xf32>
      %220 = arith.addf %218, %219 : vector<8x1xf32>
      %221 = math.rsqrt %220 : vector<8x1xf32>
      %222 = vector.broadcast %221 : vector<8x1xf32> to vector<8x32xf32>
      %223 = arith.mulf %213, %222 : vector<8x32xf32>
      %224 = vector.broadcast %204 : vector<1x32xf32> to vector<8x32xf32>
      %225 = arith.mulf %223, %224 : vector<8x32xf32>
      %226 = vector.broadcast %207 : vector<1x32xf32> to vector<8x32xf32>
      %227 = arith.addf %225, %226 : vector<8x32xf32>
      scf.yield %227 : vector<8x32xf32>
    }
    %c2_i32_5 = arith.constant 2 : i32
    %c0_6 = arith.constant 0 : index
    %c0_7 = arith.constant 0 : index
    %5 = vector.load %arg15[%c0_6, %c0_7] : memref<1x32xf32, #tpu.memory_space<vmem>>, vector<1x32xf32>
    %6 = vector.broadcast %5 : vector<1x32xf32> to vector<8x32xf32>
    %7 = arith.mulf %4, %6 : vector<8x32xf32>
    %cst = arith.constant dense<0.000000e+00> : vector<8xf32>
    %8 = vector.multi_reduction <add>, %7, %cst [1] : vector<8x32xf32> to vector<8xf32>
    %9 = vector.shape_cast %8 : vector<8xf32> to vector<8x1xf32>
    %c0_8 = arith.constant 0 : index
    %c0_9 = arith.constant 0 : index
    %10 = vector.load %arg16[%c0_8, %c0_9] : memref<1x1xf32, #tpu.memory_space<vmem>>, vector<1x1xf32>
    %11 = vector.broadcast %10 : vector<1x1xf32> to vector<8x1xf32>
    %12 = arith.addf %9, %11 : vector<8x1xf32>
    %13 = vector.shape_cast %12 : vector<8x1xf32> to vector<1x1x8xf32>
    %c0_10 = arith.constant 0 : index
    %c0_11 = arith.constant 0 : index
    %c0_12 = arith.constant 0 : index
    %14 = vector.load %arg17[%c0_10, %c0_11, %c0_12] : memref<1x1x8xf32, #tpu.memory_space<vmem>>, vector<1x1x8xf32>
    tpu.vector_store %arg17[%c0_10, %c0_11, %c0_12], %13 {strides = array<i32>} : memref<1x1x8xf32, #tpu.memory_space<vmem>>, vector<1x1x8xf32>,
    return
  }
  func.func @transform_0(%arg0: i32) -> (i32, i32, i32) {
    %c0_i32 = arith.constant 0 : i32
    %c0_i32_0 = arith.constant 0 : i32
    %c0_i32_1 = arith.constant 0 : i32
    return %arg0, %c0_i32, %c0_i32_0 : i32, i32, i32
  }
  func.func @transform_1(%arg0: i32) -> (i32, i32, i32) {
    %c0_i32 = arith.constant 0 : i32
    %c0_i32_0 = arith.constant 0 : i32
    %c0_i32_1 = arith.constant 0 : i32
    return %arg0, %c0_i32, %c0_i32_0 : i32, i32, i32
  }
  func.func @transform_2(%arg0: i32) -> (i32, i32, i32) {
    %c0_i32 = arith.constant 0 : i32
    %c0_i32_0 = arith.constant 0 : i32
    %c0_i32_1 = arith.constant 0 : i32
    %c0_i32_2 = arith.constant 0 : i32
    return %c0_i32, %c0_i32_0, %c0_i32_1 : i32, i32, i32
  }
  func.func @transform_3(%arg0: i32) -> (i32, i32, i32) {
    %c0_i32 = arith.constant 0 : i32
    %c0_i32_0 = arith.constant 0 : i32
    %c0_i32_1 = arith.constant 0 : i32
    %c0_i32_2 = arith.constant 0 : i32
    return %c0_i32, %c0_i32_0, %c0_i32_1 : i32, i32, i32
  }
  func.func @transform_4(%arg0: i32) -> (i32, i32, i32) {
    %c0_i32 = arith.constant 0 : i32
    %c0_i32_0 = arith.constant 0 : i32
    %c0_i32_1 = arith.constant 0 : i32
    %c0_i32_2 = arith.constant 0 : i32
    return %c0_i32, %c0_i32_0, %c0_i32_1 : i32, i32, i32
  }
  func.func @transform_5(%arg0: i32) -> (i32, i32, i32) {
    %c0_i32 = arith.constant 0 : i32
    %c0_i32_0 = arith.constant 0 : i32
    %c0_i32_1 = arith.constant 0 : i32
    %c0_i32_2 = arith.constant 0 : i32
    return %c0_i32, %c0_i32_0, %c0_i32_1 : i32, i32, i32
  }
  func.func @transform_6(%arg0: i32) -> (i32, i32, i32) {
    %c0_i32 = arith.constant 0 : i32
    %c0_i32_0 = arith.constant 0 : i32
    %c0_i32_1 = arith.constant 0 : i32
    %c0_i32_2 = arith.constant 0 : i32
    return %c0_i32, %c0_i32_0, %c0_i32_1 : i32, i32, i32
  }
  func.func @transform_7(%arg0: i32) -> (i32, i32, i32) {
    %c0_i32 = arith.constant 0 : i32
    %c0_i32_0 = arith.constant 0 : i32
    %c0_i32_1 = arith.constant 0 : i32
    %c0_i32_2 = arith.constant 0 : i32
    return %c0_i32, %c0_i32_0, %c0_i32_1 : i32, i32, i32
  }
  func.func @transform_8(%arg0: i32) -> (i32, i32, i32) {
    %c0_i32 = arith.constant 0 : i32
    %c0_i32_0 = arith.constant 0 : i32
    %c0_i32_1 = arith.constant 0 : i32
    %c0_i32_2 = arith.constant 0 : i32
    return %c0_i32, %c0_i32_0, %c0_i32_1 : i32, i32, i32
  }
  func.func @transform_9(%arg0: i32) -> (i32, i32, i32) {
    %c0_i32 = arith.constant 0 : i32
    %c0_i32_0 = arith.constant 0 : i32
    %c0_i32_1 = arith.constant 0 : i32
    %c0_i32_2 = arith.constant 0 : i32
    return %c0_i32, %c0_i32_0, %c0_i32_1 : i32, i32, i32
  }
  func.func @transform_10(%arg0: i32) -> (i32, i32, i32) {
    %c0_i32 = arith.constant 0 : i32
    %c0_i32_0 = arith.constant 0 : i32
    %c0_i32_1 = arith.constant 0 : i32
    %c0_i32_2 = arith.constant 0 : i32
    return %c0_i32, %c0_i32_0, %c0_i32_1 : i32, i32, i32
  }
  func.func @transform_11(%arg0: i32) -> (i32, i32, i32) {
    %c0_i32 = arith.constant 0 : i32
    %c0_i32_0 = arith.constant 0 : i32
    %c0_i32_1 = arith.constant 0 : i32
    %c0_i32_2 = arith.constant 0 : i32
    return %c0_i32, %c0_i32_0, %c0_i32_1 : i32, i32, i32
  }
  func.func @transform_12(%arg0: i32) -> (i32, i32, i32) {
    %c0_i32 = arith.constant 0 : i32
    %c0_i32_0 = arith.constant 0 : i32
    %c0_i32_1 = arith.constant 0 : i32
    %c0_i32_2 = arith.constant 0 : i32
    return %c0_i32, %c0_i32_0, %c0_i32_1 : i32, i32, i32
  }
  func.func @transform_13(%arg0: i32) -> (i32, i32, i32) {
    %c0_i32 = arith.constant 0 : i32
    %c0_i32_0 = arith.constant 0 : i32
    %c0_i32_1 = arith.constant 0 : i32
    %c0_i32_2 = arith.constant 0 : i32
    return %c0_i32, %c0_i32_0, %c0_i32_1 : i32, i32, i32
  }
  func.func @transform_14(%arg0: i32) -> (i32, i32) {
    %c0_i32 = arith.constant 0 : i32
    %c0_i32_0 = arith.constant 0 : i32
    %c0_i32_1 = arith.constant 0 : i32
    return %c0_i32, %c0_i32_0 : i32, i32
  }
  func.func @transform_15(%arg0: i32) -> (i32, i32) {
    %c0_i32 = arith.constant 0 : i32
    %c0_i32_0 = arith.constant 0 : i32
    %c0_i32_1 = arith.constant 0 : i32
    return %c0_i32, %c0_i32_0 : i32, i32
  }
  func.func @transform_16(%arg0: i32) -> (i32, i32, i32) {
    %c0_i32 = arith.constant 0 : i32
    %c0_i32_0 = arith.constant 0 : i32
    %c0_i32_1 = arith.constant 0 : i32
    return %arg0, %c0_i32, %c0_i32_0 : i32, i32, i32
  }
}

</mosaic_0001>

<bundles_post_ra>
// kernel: tpu_custom_call.1
= control target key start
LH: loop header
LB: loop body
LE: loop exit
PB: predicated region body
PF: predicated region fallthrough
CT: control target
= control target key end

     0   :  { %s2459_s0 = inlined_call_operand.vmem [shape: f32[2,8,32], index: 0, kind: input, shape index: {}]   ;;  %s2460_s1 = inlined_call_operand.vmem [shape: f32[2,1,8], index: 1, kind: input, shape index: {}]   ;;  %s2461_s2 = inlined_call_operand.vmem [shape: bf16[2,32,96], index: 2, kind: input, shape index: {}]   ;;  %s2462_s3 = inlined_call_operand.vmem [shape: f32[2,1,96], index: 3, kind: input, shape index: {}]   ;;  %s2463_s4 = inlined_call_operand.vmem [shape: bf16[2,32,32], index: 4, kind: input, shape index: {}]   ;;  %s2464_s5 = inlined_call_operand.vmem [shape: f32[2,1,32], index: 5, kind: input, shape index: {}]   ;;  %s2465_s6 = inlined_call_operand.vmem [shape: f32[2,1,32], index: 6, kind: input, shape index: {}]   ;;  %s2466_s7 = inlined_call_operand.vmem [shape: f32[2,1,32], index: 7, kind: input, shape index: {}]   ;;  %s2467_s8 = inlined_call_operand.vmem [shape: bf16[2,32,128], index: 8, kind: input, shape index: {}]   ;;  %s2468_s9 = inlined_call_operand.vmem [shape: f32[2,1,128], index: 9, kind: input, shape index: {}]   ;;  %s2469_s10 = inlined_call_operand.vmem [shape: bf16[2,128,32], index: 10, kind: input, shape index: {}]   ;;  %s2470_s11 = inlined_call_operand.vmem [shape: f32[2,1,32], index: 11, kind: input, shape index: {}]   ;;  %s2471_s12 = inlined_call_operand.vmem [shape: f32[2,1,32], index: 12, kind: input, shape index: {}]   ;;  %s2472_s13 = inlined_call_operand.vmem [shape: f32[2,1,32], index: 13, kind: input, shape index: {}]   ;;  %s2473_s14 = inlined_call_operand.vmem [shape: f32[1,32], index: 14, kind: input, shape index: {}]   ;;  %s2474_s15 = inlined_call_operand.<no memory space> [shape: f32[1,1], index: 15, kind: input, shape index: {}]   ;;  %s2475_s16 = inlined_call_operand.hbm [shape: f32[2,1,8], index: 16, kind: output, shape index: {}]  }
   0x1   :  { %2482 = sst [smem:[#allocation11_spill]] %s2459_s0  ;;  %v21_v0 = vstv %s2474_s15 }
   0x2   :  { %2483 = sst [smem:[#allocation12_spill]] %s2460_s1  ;;  %22 = vst [vmem:[#allocation2] sm:$0x1] %v21_v0 }
   0x3   :  { %23 = vsyncpa [#allocation4], 0 }
   0x4   :  { %25 = vsyncpa [#allocation4 + $0x1], 0  ;;  %s2140_s23 = smov 0   ;;  %s2142_s24 = smov 0  }
   0x5   :  { %s2144_s25 = smov 0   ;;  %s2146_s26 = smov 0  }
   0x6 LB: > { %2484 = sst [smem:[#allocation6_spill]] %s2015_s23  ;;  %s2161_s15 = sadd.s32 4294967295, %s2027_s26   ;;  %s2027_s26 = sphi %s2146_s26, %s2497_s26   ;;  %s2023_s25 = sphi %s2144_s25, %s2499_s25   ;;  %s2019_s24 = sphi %s2142_s24, %s2501_s24   ;;  %s2015_s23 = sphi %s2140_s23, %s2500_s23  }
   0x7   : > { %2485 = sst [smem:[#allocation7_spill]] %s2023_s25  ;;  %s1653_s27 = sadd.s32 4294967294, %s2027_s26  }
   0x8   : > { %s2165_s28 = sadd.s32 1, %s2027_s26   ;;  %s384_s29 = sadd.s32 1, %s2023_s25 }
   0x9   : > { %2486 = sst [smem:[#allocation8_spill]] %s2165_s28  ;;  %s381_s30 = ssub.s32 %s2027_s26, %s2165_s28 }
   0xa   : > { %p394_p0 = scmp.ne.s32.totalorder %s2023_s25, %s2019_s24  ;;  %p382_p1 = scmp.eq.s32.totalorder %s381_s30, 0 }
   0xb   : > { %p395_p2 = scmp.eq.s32.totalorder %s2161_s15, 1  ;;  %p400_p3 = scmp.ne.s32.totalorder %s2019_s24, %s2015_s23 }
   0xc   : > { %p401_p4 = scmp.eq.s32.totalorder %s1653_s27, 1  ;;  %p1656_p7 = scmp.ge.s32.totalorder %s2027_s26, 1 }
   0xd   : > { %s2176_s0 = scalar_select %p382_p1, %s2023_s25, %s384_s29  }
   0xe   : > { %p2178_p5 = por %p395_p2, %p394_p0  ;;  %p2182_p6 = por %p401_p4, %p400_p3 }
   0xf   : > { %2487 = sst [smem:[#allocation9_spill]] %s2176_s0  ;;  %p474_p8 = scmp.lt.s32.totalorder %s2027_s26, 3 }
  0x10   : > { %s2489_s18 = scalar_select %p2182_p6, 1, 0 }
  0x11   : > { %p475_p9 = pnand %p1656_p7, %p474_p8 }
  0x12   : > { %2490 = sst [smem:[#allocation10_spill]] %s2489_s18  ;;  %s2481_s19 = sand.u32 (!%p475_p9), 1, %s2019_s24  }
  0x13   : > { %478 = sbr.rel (%p475_p9) target bundleno = 4523 (0x11ab), region = 84  ;;  %p525_p10 = scmp.lt.s32.totalorder (!%p475_p9), %s2161_s15, 1 }
  0x14   : > { %s2491_s1 = sld [smem:[#allocation12_spill]] (!%p475_p9)  ;;  %s2492_s25 = sld [smem:[#allocation11_spill]] (!%p475_p9) }
  0x15   : > { %s2201_s18 = scalar_lea.vmem (!%p475_p9), [#allocation3], %s2481_s19  ;;  %s2205_s23 = smov (!%p475_p9), 0  }
  0x1a   : > { %s526_s20 = scalar_select %p525_p10, %s2161_s15, 1 }
  0x1c   : > { %s1657_s21 = sshll.u32 %s526_s20, 3  ;;  %s531_s29 = scalar_lea.vmem %s2491_s1, %s526_s20 }
  0x1d   : > { %s528_s28 = scalar_lea.vmem %s2492_s25, %s1657_s21  ;;  %v2197_v1 = vld [vmem:[%s531_s29] ss:$0 sm:$0xff] }
  0x1e   : > { %v533_v2 = vld [vmem:[%s528_s28] sm:$0xff]  }
  0x1f LB: >> { %v2037_v3 = vmov 0.0   ;;  %vm2038_vm0 = vmmov 0   ;;  %s2217_s25 = sshll.u32 %s2035_s23, 4  ;;  %s1707_s21 = sshll.u32 %s2035_s23, 6  ;;  %vm607_vm1 = vcmask 261120   ;;  %v588_v6 = vpack.c.bf16 %v2031_v2, %v2031_v2  ;;  %s2035_s23 = sphi %s2205_s23, %s540_s23   ;;  %v2031_v2 = vphi %v533_v2, %v2493_v2  }
  0x20   : >> { %1747 = vmatprep.subr.bf16.mxu1 %v2037_v3  ;;  %1751 = vmatprep.mubr.msk.bf16.mxu1 %vm2038_vm0, %v2037_v3  ;;  %s544_s20 = scalar_lea.vmem %s2461_s2, %s2217_s25  ;;  %s2231_s29 = scalar_lea.vmem %s2467_s8, %s2217_s25  ;;  %vm661_vm2 = vcmask 64512   ;;  %vm725_vm3 = vcmask 1043456  }
  0x21   : >> { %1773 = vmatprep.subr.bf16.mxu0 %v2037_v3  ;;  %1775 = vmatprep.mubr.msk.bf16.mxu0 %vm2038_vm0, %v2037_v3  ;;  %v1924_v4 = vld [vmem:[%s544_s20] sm:$0xff]   ;;  %s2236_s1 = scalar_lea.vmem %s2469_s10, %s1707_s21  ;;  %v1925_v5 = vld [vmem:[%s544_s20 + $0x8] sm:$0xff]   ;;  %s549_s0 = scalar_lea.vmem %s2462_s3, %s2035_s23 }
  0x22   : >> { %1748 = vmatpush3.bf16.msra.mxu1 %v1924_v4  ;;  %v1664_v7 = vld [vmem:[%s549_s0] ss:$0 sm:$0xff]  ;;  %s2039_s20 = smov 64   ;;  %s2040_s21 = smov 96  }
  0x23   : >> { %1749 = vmatprep.subr.bf16.mxu1 %v2037_v3  ;;  %s2041_s22 = smov 88   ;;  %s2042_s27 = smov 120  }
  0x24   : >> { %s2043_s30 = smov 56   ;;  %s2044_s28 = smov 80  }
  0x25   : >> { %s2045_s19 = smov 112   ;;  %s557_s0 = scalar_lea.vmem %s2464_s5, %s2035_s23 }
  0x26   : >> { %1750 = vmatpush3.bf16.msra.mxu1 %v1925_v5 }
  0x27   : >> { %1755 = vmatprep.subr.bf16.mxu1 %v2037_v3 }
  0x29   : >> { %1752 = vmatmul.mubr.msk.bf16.vlgmr.msra.gmra.mrb[0].mxu1 %vm607_vm1, %v588_v6 }
  0x2a   : >> { %1757 = vmatprep.mubr.msk.bf16.mxu1 %vm2038_vm0, %v2037_v3 }
  0xfc   : >> { %v645_v8 = vpop.f32.mrb[0].mxu1 }
  0xfd   : >> { %v646_v9 = vadd.f32 %v1664_v7, %v645_v8  ;;  %v1753_v10 = vpop.f32.mrb[1].mxu1 }
  0xfe   : >> { %v648_v11 = vpop.f32.mrb[2].mxu1 }
  0xff   : >> { %v2249_v12 = vpack.c.bf16 %v646_v9, %v646_v9  ;;  %v1754_v13 = vpop.f32.mrb[3].mxu1 }
 0x101   : >> { %720 = vrot.lane.b32.xlu1 %v2249_v12, %s2039_s20  ;;  %659 = vrot.lane.b32.xlu0 %v2249_v12, %s2040_s21  ;;  %s2284_s21 = scalar_lea.vmem %s2463_s4, %s2217_s25  ;;  %s2046_s25 = smov 48  }
 0x102   : >> { %v554_v51 = vld [vmem:[%s2284_s21 + $0x4] sm:$0xf]  ;;  %v553_v57 = vld [vmem:[%s2284_s21] sm:$0xf]  ;;  %s586_s20 = scalar_lea.vmem %s2470_s11, %s2035_s23 }
 0x103   : >> { %v885_v52 = vsel %vm725_vm3, %v554_v51, 0  ;;  %v931_v60 = vsel %vm725_vm3, %v553_v57, 0  ;;  %v556_v57 = vld [vmem:[%s2284_s21 + $0xc] sm:$0xf] }
 0x173   : >> { %v660_v14 = vpop.permute.xlu0 %659  ;;  %v721_v16 = vpop.permute.xlu1 %720 }
 0x174   : >> { %v666_v15 = vsel %vm661_vm2, %v660_v14, 0  ;;  %v727_v17 = vsel %vm725_vm3, %v721_v16, 0 }
 0x175   : >> { %1756 = vmatpush3.bf16.xpose.msra.mxu1 %v666_v15 }
 0x176   : >> { %1761 = vmatprep.subr.bf16.mxu1 %v2037_v3 }
 0x17c   : >> { %1758 = vmatmul.mubr.msk.bf16.vlgmr.msra.gmra.mrb[4].mxu1 %vm661_vm2, %v2249_v12 }
 0x17d   : >> { %1762 = vmatpush3.bf16.msra.mxu1 %v727_v17  ;;  %1763 = vmatprep.mubr.msk.bf16.mxu1 %vm2038_vm0, %v2037_v3 }
 0x17e   : >> { %1767 = vmatprep.subr.bf16.mxu1 %v2037_v3 }
 0x24f   : >> { %v702_v18 = vpop.f32.mrb[4].mxu1 }
 0x250   : >> { %v703_v19 = vadd.f32 %v2197_v1, %v702_v18  ;;  %v1759_v20 = vpop.f32.mrb[5].mxu1 }
 0x251   : >> { %v705_v21 = vpop.f32.mrb[6].mxu1 }
 0x252   : >> { %v1760_v22 = vpop.f32.mrb[7].mxu1  ;;  %v708_v23 = vsel %vm661_vm2, %v703_v19, -inf }
 0x253   : >> { %709 = vmax.xlane.f32.xlu0 %v708_v23 }
 0x2e0   : >> { %v710_v24 = vpop.xlane.xlu0 %709 }
 0x2e1   : >> { %v711_v25 = vsub.f32 %v703_v19, %v710_v24 }
 0x2e3   : >> { %v712_v26 = vmul.f32 1.442695, %v711_v25 }
 0x2e5   : >> { %1936 = vpow2.f32 %v712_v26 }
 0x2ef   : >> { %v1937_v27 = vpop.eup %1936 }
 0x2f0   : >> { %v714_v28 = vsel %vm661_vm2, %v1937_v27, 0.0 }
 0x2f1   : >> { %715 = vadd.xlane.f32.xlu1 %v714_v28 }
 0x302   : >> { %772 = vrot.lane.b32.xlu1 %v2249_v12, %s2041_s22  ;;  %s2047_s22 = smov 72  }
 0x306   : >> { %770 = vrot.lane.b32.xlu1 %v2249_v12, %s2042_s27  ;;  %s2048_s27 = smov 104  }
 0x37e   : >> { %v716_v29 = vpop.xlane.xlu1 %715 }
 0x37f   : >> { %1938 = vrcp.f32 %v716_v29 }
 0x382   : >> { %v773_v32 = vpop.permute.xlu1 %772 }
 0x383   : >> { %v778_v34 = vsel %vm661_vm2, %v773_v32, 0 }
 0x386   : >> { %v771_v35 = vpop.permute.xlu1 %770 }
 0x389   : >> { %v1939_v30 = vpop.eup %1938 }
 0x38a   : >> { %v718_v31 = vmul.f32 %v1939_v30, %v1937_v27 }
 0x38c   : >> { %v719_v33 = vpack.c.bf16 %v718_v31, %v718_v31 }
 0x38e   : >> { %1764 = vmatmul.mubr.msk.bf16.vlgmr.msra.gmra.mrb[8].mxu1 %vm661_vm2, %v719_v33 }
 0x38f   : >> { %1768 = vmatpush3.bf16.xpose.msra.mxu1 %v778_v34  ;;  %1769 = vmatprep.mubr.msk.bf16.mxu1 %vm2038_vm0, %v2037_v3 }
 0x390   : >> { %1779 = vmatprep.subr.bf16.mxu1 %v2037_v3 }
 0x396   : >> { %1770 = vmatmul.mubr.msk.bf16.vlgmr.msra.gmra.mrb[12].mxu1 %vm661_vm2, %v771_v35 }
 0x397   : >> { %1781 = vmatprep.mubr.msk.bf16.mxu1 %vm2038_vm0, %v2037_v3  ;;  %1780 = vmatpush3.bf16.msra.mxu1 %v885_v52 }
 0x398   : >> { %1791 = vmatprep.subr.bf16.mxu1 %v2037_v3 }
 0x461   : >> { %v763_v36 = vpop.f32.mrb[8].mxu1 }
 0x462   : >> { %v1765_v37 = vpop.f32.mrb[9].mxu1  ;;  %v769_v61 = vpack.c.bf16 %v763_v36, %v763_v36 }
 0x463   : >> { %v766_v38 = vpop.f32.mrb[10].mxu1 }
 0x464   : >> { %v1766_v39 = vpop.f32.mrb[11].mxu1 }
 0x465   : >> { %v555_v39 = vld [vmem:[%s2284_s21 + $0x8] sm:$0xf]  ;;  %s1297_s21 = scalar_lea.vmem %s2465_s6, %s2035_s23 }
 0x469   : >> { %v814_v40 = vpop.f32.mrb[12].mxu1 }
 0x46a   : >> { %v815_v41 = vadd.f32 %v2197_v1, %v814_v40  ;;  %v1771_v42 = vpop.f32.mrb[13].mxu1  ;;  %v1088_v40 = vsel %vm725_vm3, %v555_v39, 0  ;;  %v1682_v39 = vld [vmem:[%s1297_s21] ss:$0 sm:$0xff] }
 0x46b   : >> { %v817_v43 = vpop.f32.mrb[14].mxu1 }
 0x46c   : >> { %v1772_v44 = vpop.f32.mrb[15].mxu1  ;;  %v820_v45 = vsel %vm661_vm2, %v815_v41, -inf }
 0x46d   : >> { %821 = vmax.xlane.f32.xlu1 %v820_v45 }
 0x4fa   : >> { %v822_v46 = vpop.xlane.xlu1 %821 }
 0x4fb   : >> { %v823_v47 = vsub.f32 %v815_v41, %v822_v46 }
 0x4fd   : >> { %v824_v48 = vmul.f32 1.442695, %v823_v47 }
 0x4ff   : >> { %1940 = vpow2.f32 %v824_v48 }
 0x509   : >> { %v1941_v49 = vpop.eup %1940 }
 0x50a   : >> { %v826_v50 = vsel %vm661_vm2, %v1941_v49, 0.0 }
 0x50b   : >> { %827 = vadd.xlane.f32.xlu0 %v826_v50 }
 0x521   : >> { %832 = vrot.lane.b32.xlu0 %v2249_v12, %s2043_s30  ;;  %s2049_s30 = smov 40  }
 0x525   : >> { %975 = vrot.lane.b32.xlu0 %v2249_v12, %s2044_s28 }
 0x529   : >> { %973 = vrot.lane.b32.xlu0 %v2249_v12, %s2045_s19  ;;  %s565_s19 = scalar_lea.vmem %s2468_s9, %s2035_s23 }
 0x598   : >> { %v828_v53 = vpop.xlane.xlu0 %827 }
 0x599   : >> { %1942 = vrcp.f32 %v828_v53 }
 0x59c   : >> { %v833_v54 = vpop.permute.xlu0 %832 }
 0x59d   : >> { %v838_v55 = vsel %vm725_vm3, %v833_v54, 0 }
 0x59e   : >> { %1774 = vmatpush3.bf16.msra.mxu0 %v838_v55 }
 0x59f   : >> { %1785 = vmatprep.subr.bf16.mxu0 %v2037_v3 }
 0x5a0   : >> { %v976_v62 = vpop.permute.xlu0 %975 }
 0x5a1   : >> { %v981_v6 = vsel %vm661_vm2, %v976_v62, 0 }
 0x5a3   : >> { %v1943_v56 = vpop.eup %1942 }
 0x5a4   : >> { %v830_v58 = vmul.f32 %v1943_v56, %v1941_v49  ;;  %v974_v10 = vpop.permute.xlu0 %973 }
 0x5a6   : >> { %v831_v59 = vpack.c.bf16 %v830_v58, %v830_v58  ;;  %v1246_v58 = vsel %vm725_vm3, %v556_v57, 0 }
 0x5a8   : >> { %1776 = vmatmul.mubr.msk.bf16.vlgmr.msra.gmra.mrb[0].mxu0 %vm661_vm2, %v831_v59 }
 0x5a9   : >> { %1786 = vmatpush3.bf16.msra.mxu0 %v931_v60  ;;  %1787 = vmatprep.mubr.msk.bf16.mxu0 %vm2038_vm0, %v2037_v3 }
 0x5aa   : >> { %1797 = vmatprep.subr.bf16.mxu0 %v2037_v3 }
 0x5b0   : >> { %1788 = vmatmul.mubr.msk.bf16.vlgmr.msra.gmra.mrb[4].mxu0 %vm661_vm2, %v769_v61 }
 0x5b1   : >> { %1799 = vmatprep.mubr.msk.bf16.mxu0 %vm2038_vm0, %v2037_v3 }
 0x67b   : >> { %v874_v63 = vpop.f32.mrb[0].mxu0 }
 0x67c   : >> { %v880_v0 = vpack.c.bf16 %v874_v63, %v874_v63  ;;  %v1777_v4 = vpop.f32.mrb[1].mxu0 }
 0x67d   : >> { %v877_v5 = vpop.f32.mrb[2].mxu0 }
 0x67e   : >> { %v1778_v7 = vpop.f32.mrb[3].mxu0  ;;  %1782 = vmatmul.mubr.msk.bf16.vlgmr.msra.gmra.mrb[16].mxu1 %vm661_vm2, %v880_v0 }
 0x67f   : >> { %1792 = vmatpush3.bf16.xpose.msra.mxu1 %v981_v6  ;;  %1793 = vmatprep.mubr.msk.bf16.mxu1 %vm2038_vm0, %v2037_v3 }
 0x680   : >> { %1803 = vmatprep.subr.bf16.mxu1 %v2037_v3 }
 0x683   : >> { %v967_v8 = vpop.f32.mrb[4].mxu0 }
 0x684   : >> { %v1789_v9 = vpop.f32.mrb[5].mxu0 }
 0x685   : >> { %v970_v11 = vpop.f32.mrb[6].mxu0 }
 0x686   : >> { %v1790_v13 = vpop.f32.mrb[7].mxu0  ;;  %1794 = vmatmul.mubr.msk.bf16.vlgmr.msra.gmra.mrb[20].mxu1 %vm661_vm2, %v974_v10 }
 0x687   : >> { %1805 = vmatprep.mubr.msk.bf16.mxu1 %vm2038_vm0, %v2037_v3  ;;  %1804 = vmatpush3.bf16.msra.mxu1 %v1088_v40 }
 0x688   : >> { %1815 = vmatprep.subr.bf16.mxu1 %v2037_v3 }
 0x751   : >> { %v921_v14 = vpop.f32.mrb[16].mxu1 }
 0x752   : >> { %v2308_v15 = vadd.f32 %v967_v8, %v921_v14  ;;  %v1783_v16 = vpop.f32.mrb[17].mxu1  ;;  %v1681_v14 = vld [vmem:[%s557_s0] ss:$0 sm:$0xff] }
 0x753   : >> { %v924_v17 = vpop.f32.mrb[18].mxu1 }
 0x754   : >> { %v1784_v18 = vpop.f32.mrb[19].mxu1 }
 0x759   : >> { %v1017_v19 = vpop.f32.mrb[20].mxu1 }
 0x75a   : >> { %v1018_v20 = vadd.f32 %v2197_v1, %v1017_v19  ;;  %v1795_v21 = vpop.f32.mrb[21].mxu1 }
 0x75b   : >> { %v1020_v22 = vpop.f32.mrb[22].mxu1 }
 0x75c   : >> { %v1796_v23 = vpop.f32.mrb[23].mxu1  ;;  %v1023_v24 = vsel %vm661_vm2, %v1018_v20, -inf }
 0x75d   : >> { %1024 = vmax.xlane.f32.xlu1 %v1023_v24 }
 0x76e   : >> { %1035 = vrot.lane.b32.xlu1 %v2249_v12, %s2046_s25  ;;  %s1488_s25 = scalar_lea.vmem %s2471_s12, %s2035_s23 }
 0x772   : >> { %1133 = vrot.lane.b32.xlu1 %v2249_v12, %s2047_s22 }
 0x776   : >> { %1131 = vrot.lane.b32.xlu1 %v2249_v12, %s2048_s27  ;;  %s1299_s27 = scalar_lea.vmem %s2466_s7, %s2035_s23 }
 0x7ea   : >> { %v1025_v25 = vpop.xlane.xlu1 %1024 }
 0x7eb   : >> { %v1026_v26 = vsub.f32 %v1018_v20, %v1025_v25 }
 0x7ed   : >> { %v1027_v27 = vmul.f32 1.442695, %v1026_v26 }
 0x7ee   : >> { %v1036_v28 = vpop.permute.xlu1 %1035 }
 0x7ef   : >> { %1944 = vpow2.f32 %v1027_v27  ;;  %v1041_v29 = vsel %vm725_vm3, %v1036_v28, 0  ;;  %v1926_v28 = vld [vmem:[%s2231_s29] sm:$0xff]  }
 0x7f0   : >> { %1798 = vmatpush3.bf16.msra.mxu0 %v1041_v29  ;;  %v1927_v29 = vld [vmem:[%s2231_s29 + $0x8] sm:$0xff]  }
 0x7f1   : >> { %1809 = vmatprep.subr.bf16.mxu0 %v2037_v3 }
 0x7f2   : >> { %v1134_v35 = vpop.permute.xlu1 %1133 }
 0x7f3   : >> { %v1139_v37 = vsel %vm661_vm2, %v1134_v35, 0 }
 0x7f6   : >> { %v1132_v38 = vpop.permute.xlu1 %1131 }
 0x7f9   : >> { %v1945_v30 = vpop.eup %1944 }
 0x7fa   : >> { %v1029_v31 = vsel %vm661_vm2, %v1945_v30, 0.0 }
 0x7fb   : >> { %1030 = vadd.xlane.f32.xlu0 %v1029_v31  ;;  %v1930_v31 = vld [vmem:[%s2236_s1 + $0x10] sm:$0xff]  }
 0x888   : >> { %v1031_v32 = vpop.xlane.xlu0 %1030 }
 0x889   : >> { %1946 = vrcp.f32 %v1031_v32  ;;  %v1931_v32 = vld [vmem:[%s2236_s1 + $0x18] sm:$0xff]  }
 0x893   : >> { %v1947_v33 = vpop.eup %1946 }
 0x894   : >> { %v1033_v34 = vmul.f32 %v1947_v33, %v1945_v30  ;;  %v1929_v30 = vld [vmem:[%s2236_s1 + $0x8] sm:$0xff]   ;;  %v1932_v33 = vld [vmem:[%s2236_s1 + $0x20] sm:$0xff]  }
 0x896   : >> { %v1034_v36 = vpack.c.bf16 %v1033_v34, %v1033_v34  ;;  %v1933_v34 = vld [vmem:[%s2236_s1 + $0x28] sm:$0xff]  }
 0x898   : >> { %1800 = vmatmul.mubr.msk.bf16.vlgmr.msra.gmra.mrb[8].mxu0 %vm661_vm2, %v1034_v36 }
 0x899   : >> { %1810 = vmatpush3.bf16.xpose.msra.mxu0 %v1139_v37  ;;  %1811 = vmatprep.mubr.msk.bf16.mxu0 %vm2038_vm0, %v2037_v3 }
 0x89a   : >> { %1821 = vmatprep.subr.bf16.mxu0 %v2037_v3 }
 0x8a0   : >> { %1812 = vmatmul.mubr.msk.bf16.vlgmr.msra.gmra.mrb[12].mxu0 %vm661_vm2, %v1132_v38 }
 0x8a1   : >> { %1823 = vmatprep.mubr.msk.bf16.mxu0 %vm2038_vm0, %v2037_v3  ;;  %1822 = vmatpush3.bf16.msra.mxu0 %v1246_v58 }
 0x8a2   : >> { %1835 = vmatprep.subr.bf16.mxu0 %v2037_v3 }
 0x96b   : >> { %v1077_v41 = vpop.f32.mrb[8].mxu0 }
 0x96c   : >> { %v1083_v42 = vpack.c.bf16 %v1077_v41, %v1077_v41  ;;  %v1801_v43 = vpop.f32.mrb[9].mxu0  ;;  %v1683_v41 = vld [vmem:[%s1299_s27] ss:$0 sm:$0xff] }
 0x96d   : >> { %v1080_v44 = vpop.f32.mrb[10].mxu0 }
 0x96e   : >> { %v1802_v45 = vpop.f32.mrb[11].mxu0  ;;  %1806 = vmatmul.mubr.msk.bf16.vlgmr.msra.gmra.mrb[24].mxu1 %vm661_vm2, %v1083_v42 }
 0x96f   : >> { %1817 = vmatprep.mubr.msk.bf16.mxu1 %vm2038_vm0, %v2037_v3  ;;  %v1934_v45 = vld [vmem:[%s2236_s1 + $0x30] sm:$0xff]  }
 0x973   : >> { %v1175_v46 = vpop.f32.mrb[12].mxu0 }
 0x974   : >> { %v1176_v47 = vadd.f32 %v2197_v1, %v1175_v46  ;;  %v1813_v48 = vpop.f32.mrb[13].mxu0  ;;  %v1935_v46 = vld [vmem:[%s2236_s1 + $0x38] sm:$0xff]  }
 0x975   : >> { %v1178_v49 = vpop.f32.mrb[14].mxu0 }
 0x976   : >> { %v1814_v50 = vpop.f32.mrb[15].mxu0  ;;  %v1181_v51 = vsel %vm661_vm2, %v1176_v47, -inf }
 0x977   : >> { %1182 = vmax.xlane.f32.xlu1 %v1181_v51 }
 0xa04   : >> { %v1183_v52 = vpop.xlane.xlu1 %1182 }
 0xa05   : >> { %v1184_v53 = vsub.f32 %v1176_v47, %v1183_v52  ;;  %v1684_v47 = vld [vmem:[%s565_s19] ss:$0 sm:$0xff] }
 0xa07   : >> { %v1185_v54 = vmul.f32 1.442695, %v1184_v53 }
 0xa09   : >> { %1948 = vpow2.f32 %v1185_v54 }
 0xa13   : >> { %v1949_v55 = vpop.eup %1948 }
 0xa14   : >> { %v1187_v56 = vsel %vm661_vm2, %v1949_v55, 0.0 }
 0xa15   : >> { %1188 = vadd.xlane.f32.xlu0 %v1187_v56 }
 0xa2b   : >> { %1193 = vrot.lane.b32.xlu0 %v2249_v12, %s2049_s30  ;;  %s1490_s30 = scalar_lea.vmem %s2472_s13, %s2035_s23  ;;  %s540_s23 = sadd.s32 1, %s2035_s23  }
 0xa2c   : >> { %p537_p11 = scmp.ge.s32.totalorder %s540_s23, 2  }
 0xa2d   : > { %s1701_s23 = sshll.u32 (%p537_p11), %s2161_s15, 4  ;;  %s1565_s0 = sshll.u32 (%p537_p11), %s2201_s18, 4  ;;  %vm1550_vm4 = vcmask (%p537_p11), 57344   ;;  %s2416_s0 = int_to_ptr.vmem [resolvable:$true] %s1565_s0 }
 0xa2e   : > { %s2494_s21 = sand.u32 (%p537_p11), 1, %s2019_s24   ;;  %s1957_s22 = scalar_lea.vmem (%p537_p11), %s2416_s0, 16 }
 0xa2f   : > { %p1958_p12 = scmp.ne.s32.totalorder (%p537_p11), %s2416_s0, %s1957_s22  ;;  %s2051_s15 = smov (%p537_p11), [#allocation3]  }
 0xa30   : > { %s1961_s27 = sshll.u32 (%p537_p11), %s2051_s15, 4  ;;  %s1962_s27 = int_to_ptr.vmem [resolvable:$false] %s1961_s27 }
 0xa31   : > { %p1959_p13 = pnand (%p537_p11), %p1958_p12, %p2178_p5  ;;  %p1964_p1 = scmp.lt.s32.totalorder (%p537_p11), %s2416_s0, %s1962_s27 }
 0xa33   : > { %p1960_p0 = pneg (%p537_p11), %p1959_p13 }
 0xa41   : >> { %v1124_v59 = vpop.f32.mrb[24].mxu1 }
 0xa42   : >> { %v1130_v60 = vadd.f32 %v1124_v59, %v2308_v15  ;;  %v1807_v61 = vpop.f32.mrb[25].mxu1 }
 0xa43   : >> { %v1127_v62 = vpop.f32.mrb[26].mxu1 }
 0xa44   : >> { %v1808_v63 = vpop.f32.mrb[27].mxu1 }
 0xaa2   : >> { %v1189_v0 = vpop.xlane.xlu0 %1188 }
 0xaa3   : >> { %1950 = vrcp.f32 %v1189_v0 }
 0xaa6   : >> { %v1194_v4 = vpop.permute.xlu0 %1193 }
 0xaa7   : >> { %v1199_v5 = vsel %vm725_vm3, %v1194_v4, 0 }
 0xaa8   : >> { %1816 = vmatpush3.bf16.msra.mxu1 %v1199_v5 }
 0xaa9   : >> { %1827 = vmatprep.subr.bf16.mxu1 %v2037_v3 }
 0xaad   : >> { %v1951_v12 = vpop.eup %1950 }
 0xaae   : >> { %v1191_v6 = vmul.f32 %v1951_v12, %v1949_v55 }
 0xab0   : >> { %v1192_v7 = vpack.c.bf16 %v1191_v6, %v1191_v6 }
 0xab2   : >> { %1818 = vmatmul.mubr.msk.bf16.vlgmr.msra.gmra.mrb[28].mxu1 %vm661_vm2, %v1192_v7 }
 0xab3   : >> { %1831 = vmatprep.mubr.msk.bf16.mxu1 %vm2038_vm0, %v2037_v3  ;;  %1828 = vmatpush3.bf16.msra.mxu1 %v1926_v28 }
 0xab4   : >> { %1829 = vmatprep.subr.bf16.mxu1 %v2037_v3 }
 0xab7   : >> { %1830 = vmatpush3.bf16.msra.mxu1 %v1927_v29 }
 0xb85   : >> { %v1235_v8 = vpop.f32.mrb[28].mxu1 }
 0xb86   : >> { %v1241_v9 = vpack.c.bf16 %v1235_v8, %v1235_v8  ;;  %v1819_v10 = vpop.f32.mrb[29].mxu1 }
 0xb87   : >> { %v1238_v11 = vpop.f32.mrb[30].mxu1 }
 0xb88   : >> { %v1820_v13 = vpop.f32.mrb[31].mxu1  ;;  %1824 = vmatmul.mubr.msk.bf16.vlgmr.msra.gmra.mrb[16].mxu0 %vm661_vm2, %v1241_v9  ;;  %v1697_v9 = vld [vmem:[%s1488_s25] ss:$0 sm:$0xff]  ;;  %s1553_s25 = scalar_lea.sflag (%p537_p11), [#allocation4], %s2494_s21 }
 0xb89   : >> { %1851 = vmatprep.mubr.msk.bf16.mxu0 %vm2038_vm0, %v2037_v3  ;;  %v1698_v11 = vld [vmem:[%s1490_s30] ss:$0 sm:$0xff]  ;;  %s1963_s30 = scalar_lea.vmem (%p537_p11), %s1962_s27, 32 }
 0xb8a   : > { %p1965_p2 = scmp.lt.s32.totalorder (%p537_p11), %s1963_s30, %s1957_s22 }
 0xb8c   : > { %p1966_p3 = por (%p537_p11), %p1965_p2, %p1964_p1 }
 0xb8e   : > { %p1967_p4 = pnand (%p537_p11), %p1966_p3, %p1960_p0 }
 0xc5b   : >> { %v1282_v15 = vpop.f32.mrb[16].mxu0 }
 0xc5c   : >> { %v1288_v16 = vadd.f32 %v1282_v15, %v1130_v60  ;;  %v1825_v17 = vpop.f32.mrb[17].mxu0  ;;  %v1699_v15 = vld [vmem:[%s2473_s14] ss:$0 sm:$0xff] (%p537_p11) }
 0xc5d   : >> { %v1285_v18 = vpop.f32.mrb[18].mxu0 }
 0xc5e   : >> { %v1295_v19 = vadd.f32 %v1681_v14, %v1288_v16  ;;  %v1826_v20 = vpop.f32.mrb[19].mxu0  ;;  %v2050_v18 = vmov (%p537_p11), 0  }
 0xc5f   : > { %1956 = vset.pattern.permute.xlu0 (%p537_p11), %v2050_v18 }
 0xc60   : >> { %v1296_v21 = vadd.f32 %v2031_v2, %v1295_v19  ;;  %v1928_v2 = vld [vmem:[%s2236_s1] sm:$0xff]   ;;  %s2414_s1 = scalar_lea.hbm (%p537_p11), %s2475_s16, %s1701_s23 }
 0xc61   : >> { %1836 = vmatpush3.bf16.msra.mxu0 %v1928_v2  ;;  %v1700_v19 = vld [vmem:[#allocation2] ss:$0 sm:$0xff] (%p537_p11) }
 0xc62   : >> { %v1301_v22 = vsel %vm607_vm1, %v1296_v21, 0.0  ;;  %1837 = vmatprep.subr.bf16.mxu0 %v2037_v3 }
 0xc63   : >> { %1302 = vadd.xlane.f32.xlu0 %v1301_v22  ;;  %v1543_v22 = vlaneseq (%p537_p11) }
 0xc65   : >> { %1838 = vmatpush3.bf16.msra.mxu0 %v1929_v30  ;;  %v1544_v1 = vand.u32 (%p537_p11), 127, %v1543_v22 }
 0xc66   : >> { %1839 = vmatprep.subr.bf16.mxu0 %v2037_v3 }
 0xc69   : >> { %1840 = vmatpush3.bf16.msra.mxu0 %v1930_v31 }
 0xc6a   : >> { %1841 = vmatprep.subr.bf16.mxu0 %v2037_v3 }
 0xc6d   : >> { %1842 = vmatpush3.bf16.msra.mxu0 %v1931_v32 }
 0xc6e   : >> { %1843 = vmatprep.subr.bf16.mxu0 %v2037_v3 }
 0xc71   : >> { %1844 = vmatpush3.bf16.msra.mxu0 %v1932_v33 }
 0xc72   : >> { %1845 = vmatprep.subr.bf16.mxu0 %v2037_v3 }
 0xc75   : >> { %1846 = vmatpush3.bf16.msra.mxu0 %v1933_v34 }
 0xc76   : >> { %1847 = vmatprep.subr.bf16.mxu0 %v2037_v3 }
 0xc79   : >> { %1848 = vmatpush3.bf16.msra.mxu0 %v1934_v45 }
 0xc7a   : >> { %1849 = vmatprep.subr.bf16.mxu0 %v2037_v3  ;;  %v1688_v3 = vld [vmem:[%s586_s20] ss:$0 sm:$0xff] }
 0xc7d   : >> { %1850 = vmatpush3.bf16.msra.mxu0 %v1935_v46 }
 0xcf0   : >> { %v1303_v23 = vpop.xlane.xlu0 %1302 }
 0xcf1   : >> { %v1305_v24 = vmul.f32 0.03125, %v1303_v23  ;;  %v1546_v23 = vshrl.u32 (%p537_p11), %v1543_v22, 7 }
 0xcf3   : >> { %v1306_v25 = vsub.f32 %v1296_v21, %v1305_v24  ;;  %v1547_v24 = vsub.s32 (%p537_p11), %v1544_v1, %v1546_v23 }
 0xcf5   : >> { %v1307_v26 = vmul.f32 %v1306_v25, %v1306_v25 }
 0xcf7   : >> { %v1308_v27 = vsel %vm607_vm1, %v1307_v26, 0.0 }
 0xcf8   : >> { %1309 = vadd.xlane.f32.xlu1 %v1308_v27 }
 0xd85   : >> { %v1310_v35 = vpop.xlane.xlu1 %1309 }
 0xd86   : >> { %v1311_v36 = vmul.f32 0.03125, %v1310_v35 }
 0xd88   : >> { %v1312_v37 = vadd.f32 1e-05, %v1311_v36 }
 0xd8a   : >> { %1952 = vrsqrt.f32 %v1312_v37 }
 0xd94   : >> { %v1953_v38 = vpop.eup %1952 }
 0xd95   : >> { %v1314_v40 = vmul.f32 %v1953_v38, %v1306_v25 }
 0xd97   : >> { %v1321_v42 = vmul.f32 %v1682_v39, %v1314_v40 }
 0xd99   : >> { %v1328_v43 = vadd.f32 %v1683_v41, %v1321_v42 }
 0xd9b   : >> { %v1329_v44 = vpack.c.bf16 %v1328_v43, %v1328_v43 }
 0xd9d   : >> { %1832 = vmatmul.mubr.msk.bf16.vlgmr.msra.gmra.mrb[32].mxu1 %vm607_vm1, %v1329_v44 }
 0xe70   : >> { %v1385_v48 = vpop.f32.mrb[32].mxu1 }
 0xe71   : >> { %v1386_v49 = vadd.f32 %v1684_v47, %v1385_v48  ;;  %v1833_v50 = vpop.f32.mrb[33].mxu1 }
 0xe72   : >> { %v1388_v51 = vpop.f32.mrb[34].mxu1 }
 0xe73   : >> { %v1391_v52 = vmax.f32 %v1386_v49, 0.0  ;;  %v1834_v53 = vpop.f32.mrb[35].mxu1 }
 0xe75   : >> { %v1392_v54 = vpack.c.bf16 %v1391_v52, %v1391_v52 }
 0xe77   : >> { %1852 = vmatmul.mubr.bf16.vlgmr.msra.gmra.mrb[20].mxu0 %v1392_v54 }
 0xf4a   : >> { %v1481_v55 = vpop.f32.mrb[20].mxu0 }
 0xf4b   : >> { %v1482_v56 = vadd.f32 %v1688_v3, %v1481_v55  ;;  %v1853_v57 = vpop.f32.mrb[21].mxu0 }
 0xf4c   : >> { %v1484_v58 = vpop.f32.mrb[22].mxu0 }
 0xf4d   : >> { %v1854_v59 = vpop.f32.mrb[23].mxu0  ;;  %v1487_v60 = vadd.f32 %v1482_v56, %v1328_v43 }
 0xf4f   : >> { %v1492_v61 = vsel %vm607_vm1, %v1487_v60, 0.0 }
 0xf50   : >> { %1493 = vadd.xlane.f32.xlu1 %v1492_v61 }
 0xfdd   : >> { %v1494_v62 = vpop.xlane.xlu1 %1493 }
 0xfde   : >> { %v1495_v63 = vmul.f32 0.03125, %v1494_v62 }
 0xfe0   : >> { %v1496_v0 = vsub.f32 %v1487_v60, %v1495_v63 }
 0xfe2   : >> { %v1497_v4 = vmul.f32 %v1496_v0, %v1496_v0 }
 0xfe4   : >> { %v1498_v5 = vsel %vm607_vm1, %v1497_v4, 0.0 }
 0xfe5   : >> { %1499 = vadd.xlane.f32.xlu1 %v1498_v5 }
0x1072   : >> { %v1500_v12 = vpop.xlane.xlu1 %1499 }
0x1073   : >> { %v1501_v6 = vmul.f32 0.03125, %v1500_v12 }
0x1075   : >> { %v1502_v7 = vadd.f32 1e-05, %v1501_v6 }
0x1077   : >> { %1954 = vrsqrt.f32 %v1502_v7 }
0x1081   : >> { %v1955_v8 = vpop.eup %1954 }
0x1082   : >> { %v1504_v10 = vmul.f32 %v1955_v8, %v1496_v0  ;;  %539 = sbr.rel (!%p537_p11) target bundleno = 31 (0x1f), region = 141 }
0x1084   : >> { %v1511_v13 = vmul.f32 %v1697_v9, %v1504_v10 }
0x1086   : >> { %v1518_v14 = vadd.f32 %v1698_v11, %v1511_v13  }
0x1088   : >> { %v2493_v2 = vmov %v1518_v14  ;;  %v1526_v16 = vmul.f32 (%p537_p11), %v1699_v15, %v1518_v14 }
0x108a   : > { %v1528_v17 = vsel %vm607_vm1, %v1526_v16, 0.0 }
0x108b   : > { %1529 = vadd.xlane.f32.xlu0 %v1528_v17 }
0x1118   : > { %v1530_v20 = vpop.xlane.xlu0 %1529 }
0x1119   : > { %v1538_v21 = vadd.f32 %v1700_v19, %v1530_v20 }
0x111b   : > { %1541 = vperm.xlu0 %1956, %v1538_v21  }
0x119a   : > { %v1542_v25 = vpop.permute.xlu0 %1541 }
0x119b   : > { %v1548_v26 = vrot.slane %v1542_v25, %v1547_v24 }
0x119d   : > { %1551 = vst.msk [vmem:[%s2201_s18] sm:$0x1] %vm1550_vm4, %v1548_v26 }
0x119e   : > { %1970 = shalt.err (!%p1967_p4)
}
0x119f   : > { %s1971_s18 = scalar_lea.hbm %s2414_s1, 16  ;;  %s1975_s23 = scalar_lea.hbm %s2475_s16, 32 }
0x11a0   : > { %p1972_p7 = scmp.ne.s32.totalorder %s2414_s1, %s1971_s18  ;;  %p1976_p10 = scmp.lt.u32.totalorder %s2414_s1, %s2475_s16 }
0x11a1   : > { %p1977_p11 = scmp.lt.u32.totalorder %s1975_s23, %s1971_s18  ;;  %p1979_p13 = scmp.lt.u32.totalorder %s1971_s18, %s2414_s1 }
0x11a2   : > { %p1973_p8 = pnand %p1972_p7, %p2178_p5 }
0x11a3   : > { %p1978_p12 = por %p1977_p11, %p1976_p10 }
0x11a4   : > { %p1974_p9 = pneg %p1973_p8 }
0x11a5   : > { %p1980_p0 = por %p1979_p13, %p1978_p12 }
0x11a7   : > { %p1981_p1 = pnand %p1980_p0, %p1974_p9 }
0x11a9   : > { %1984 = shalt.err (!%p1981_p1)
}
0x11aa   : > { %1855 = dma.vmem_to_hbm [thread:$0]  (%p2178_p5), %s2416_s0, 16, %s2414_s1, %s1553_s25  }
0x11ab PF: > { %s2495_s21 = sld [smem:[#allocation6_spill]]  ;;  %p1861_p2 = scmp.ge.s32.totalorder %s2027_s26, 2 }
0x11ad   : > { %p1858_p3 = pnand %p1861_p2, %p2182_p6 }
0x11b1   : > { %s1577_s15 = sand.u32 1, %s2495_s21  }
0x11b2   : > { %s1578_s27 = scalar_lea.sflag [#allocation4], %s1577_s15 }
0x11b3   : > { %2010 = dma.done.wait (!%p1858_p3), %s1578_s27, 16  }
0x11b4   : > { %2012 = vsyncadd (!%p1858_p3), %s1578_s27, 4294967280  ;;  %s2497_s26 = sld [smem:[#allocation8_spill]]  ;;  %s2498_s30 = sld [smem:[#allocation7_spill]] }
0x11b5   : > { %s2499_s25 = sld [smem:[#allocation9_spill]]  ;;  %s2500_s23 = smov %s2019_s24 }
0x11ba   : > { %p28_p4 = scmp.ge.s32.totalorder %s2497_s26, 4   ;;  %s2501_s24 = smov %s2498_s30 }
0x11bc   :  { %30 = sbr.rel (!%p28_p4) target bundleno = 6 (0x6), region = 152 }
0x11c3   :  { %1582 = vsyncpa [#allocation4], 1 }
0x11c4   :  { %1584 = vsyncpa [#allocation4 + $0x1], 1 }

</bundles_post_ra>
